<compile_context>
chip_gen: v5e
topology: v5e:2x2
jax: 0.10.0
libtpu: 0.0.40
codegen_flags: <defaults>
</compile_context>

<pallas_src>
import jax
import jax.numpy as jnp
from jax.experimental import pallas as pl
from jax.experimental.pallas import tpu as pltpu


def _round_up(n, m):
    return (n + m - 1) // m * m


def ddqn_kernel(x_ref, w1_ref, b1_ref, w2_ref, b2_ref, w3_ref, b3_ref, o_ref):
    bf16 = jnp.bfloat16
    # Layer 1: (TB, IN) @ (IN, H1P) + (1, H1P) -> ReLU   (bf16 operands, f32 acc)
    h1 = jnp.dot(x_ref[...], w1_ref[...], preferred_element_type=jnp.float32)
    h1 = jnp.maximum(h1 + b1_ref[...], 0.0)
    # Layer 2: (TB, H1P) @ (H1P, H2P) + (1, H2P) -> ReLU
    h2 = jnp.dot(h1.astype(bf16), w2_ref[...], preferred_element_type=jnp.float32)
    h2 = jnp.maximum(h2 + b2_ref[...], 0.0)
    # Layer 3: (TB, H2P) @ (H2P, OUTP) + (1, OUTP)   (no activation)
    o = jnp.dot(h2.astype(bf16), w3_ref[...], preferred_element_type=jnp.float32)
    o_ref[...] = (o + b3_ref[...]).astype(o_ref.dtype)


def ddqn_forward(x, w1, b1, w2, b2, w3, b3, *, batch_tile=128):
    """y = relu(x@w1+b1) ; y = relu(y@w2+b2) ; y = y@w3+b3  (PyTorch nn.Linear semantics)."""
    B, in_dim = x.shape
    H1 = w1.shape[1]
    H2 = w2.shape[1]
    OUT = w3.shape[1]

    # Pad feature dims to lane multiples of 128 and the batch to the batch tile.
    H1P = _round_up(H1, 128)
    H2P = _round_up(H2, 128)
    OUTP = _round_up(OUT, 128)
    TB = batch_tile
    BP = _round_up(max(B, 1), TB)

    bf16 = jnp.bfloat16
    xp = jnp.zeros((BP, in_dim), bf16).at[:B, :].set(x.astype(bf16))
    w1p = jnp.zeros((in_dim, H1P), bf16).at[:, :H1].set(w1.astype(bf16))
    b1p = jnp.zeros((1, H1P), jnp.float32).at[:, :H1].set(b1.astype(jnp.float32))
    w2p = jnp.zeros((H1P, H2P), bf16).at[:H1, :H2].set(w2.astype(bf16))
    b2p = jnp.zeros((1, H2P), jnp.float32).at[:, :H2].set(b2.astype(jnp.float32))
    w3p = jnp.zeros((H2P, OUTP), bf16).at[:H2, :OUT].set(w3.astype(bf16))
    b3p = jnp.zeros((1, OUTP), jnp.float32).at[:, :OUT].set(b3.astype(jnp.float32))

    def const_spec(shape):
        # Weights/biases: same block every grid step -> stay resident in VMEM.
        return pl.BlockSpec(shape, lambda i: (0, 0))

    out = pl.pallas_call(
        ddqn_kernel,
        out_shape=jax.ShapeDtypeStruct((BP, OUTP), jnp.float32),
        grid=(BP // TB,),
        in_specs=[
            pl.BlockSpec((TB, in_dim), lambda i: (i, 0)),  # x tiled over batch
            const_spec((in_dim, H1P)),
            const_spec((1, H1P)),
            const_spec((H1P, H2P)),
            const_spec((1, H2P)),
            const_spec((H2P, OUTP)),
            const_spec((1, OUTP)),
        ],
        out_specs=pl.BlockSpec((TB, OUTP), lambda i: (i, 0)),
        compiler_params=pltpu.CompilerParams(
            dimension_semantics=("parallel",),
        ),
    )(xp, w1p, b1p, w2p, b2p, w3p, b3p)

    return out[:B, :OUT]


def init_params(key, input_size, hidden1=800, hidden2=200, out=4):
    """Mirror PyTorch nn.Linear default init; weights stored (in, out), biases (1, out)."""
    ks = jax.random.split(key, 6)

    def uniform(k, shape, fan_in):
        bound = 1.0 / jnp.sqrt(fan_in)
        return jax.random.uniform(k, shape, jnp.float32, -bound, bound)

    w1 = uniform(ks[0], (input_size, hidden1), input_size)
    b1 = uniform(ks[1], (1, hidden1), input_size)
    w2 = uniform(ks[2], (hidden1, hidden2), hidden1)
    b2 = uniform(ks[3], (1, hidden2), hidden1)
    w3 = uniform(ks[4], (hidden2, out), hidden2)
    b3 = uniform(ks[5], (1, out), hidden2)
    return w1, b1, w2, b2, w3, b3


def reference_forward(x, w1, b1, w2, b2, w3, b3):
    # Mirrors the kernel's bf16-operand / f32-accumulate math.
    bf16 = jnp.bfloat16
    h1 = jnp.dot(x.astype(bf16), w1.astype(bf16), preferred_element_type=jnp.float32)
    h1 = jnp.maximum(h1 + b1, 0.0)
    h2 = jnp.dot(h1.astype(bf16), w2.astype(bf16), preferred_element_type=jnp.float32)
    h2 = jnp.maximum(h2 + b2, 0.0)
    o = jnp.dot(h2.astype(bf16), w3.astype(bf16), preferred_element_type=jnp.float32)
    return o + b3


if __name__ == "__main__":
    key = jax.random.PRNGKey(0)
    kx, kp = jax.random.split(key)

    batch = 2
    input_size = 8  # LunarLander observation size
    x = jax.random.normal(kx, (batch, input_size), jnp.float32)

    params = init_params(kp, input_size)

    out = ddqn_forward(x, *params)
    out = jax.block_until_ready(out)

    ref = reference_forward(x, *params)
    assert out.shape == (batch, 4)
    assert jnp.allclose(out, ref, atol=1e-2, rtol=1e-2), (
        f"max abs err {jnp.max(jnp.abs(out - ref))}"
    )

    print("KERNEL_OK")
</pallas_src>

<mosaic_0001>
module attributes {stable_mosaic.version = 11 : i64} {
  func.func @ddqn_kernel(%arg0: i32, %arg1: memref<128x8xbf16, #tpu.memory_space<vmem>>, %arg2: memref<8x896xbf16, #tpu.memory_space<vmem>>, %arg3: memref<1x896xf32, #tpu.memory_space<vmem>>, %arg4: memref<896x256xbf16, #tpu.memory_space<vmem>>, %arg5: memref<1x256xf32, #tpu.memory_space<vmem>>, %arg6: memref<256x128xbf16, #tpu.memory_space<vmem>>, %arg7: memref<1x128xf32, #tpu.memory_space<vmem>>, %arg8: memref<128x128xf32, #tpu.memory_space<vmem>>) attributes {dimension_semantics = [#tpu.dimension_semantics<parallel>], iteration_bounds = array<i64: 1>, scalar_prefetch = 0 : i64, scratch_operands = 0 : i64, tpu.core_type = #tpu.core_type<tc>, window_params = [{transform_indices = @transform_0, window_bounds = array<i64: 128, 8>}, {pipeline_mode = #tpu.pipeline_mode<synchronous>, transform_indices = @transform_1, window_bounds = array<i64: 8, 896>}, {pipeline_mode = #tpu.pipeline_mode<synchronous>, transform_indices = @transform_2, window_bounds = array<i64: 1, 896>}, {pipeline_mode = #tpu.pipeline_mode<synchronous>, transform_indices = @transform_3, window_bounds = array<i64: 896, 256>}, {pipeline_mode = #tpu.pipeline_mode<synchronous>, transform_indices = @transform_4, window_bounds = array<i64: 1, 256>}, {pipeline_mode = #tpu.pipeline_mode<synchronous>, transform_indices = @transform_5, window_bounds = array<i64: 256, 128>}, {pipeline_mode = #tpu.pipeline_mode<synchronous>, transform_indices = @transform_6, window_bounds = array<i64: 1, 128>}, {transform_indices = @transform_7, window_bounds = array<i64: 128, 128>}]} {
    %c0 = arith.constant 0 : index
    %c0_0 = arith.constant 0 : index
    %0 = vector.load %arg1[%c0, %c0_0] : memref<128x8xbf16, #tpu.memory_space<vmem>>, vector<128x8xbf16>
    %c0_1 = arith.constant 0 : index
    %c0_2 = arith.constant 0 : index
    %1 = vector.load %arg2[%c0_1, %c0_2] : memref<8x896xbf16, #tpu.memory_space<vmem>>, vector<8x896xbf16>
    %cst = arith.constant dense<0.000000e+00> : vector<128x896xf32>
    %2 = tpu.matmul %0, %1, %cst {dimension_numbers = #tpu.dot_dimension_numbers<[1], [0], [0], [1], [0, 0, 1, 1], [], []>} : vector<128x8xbf16>, vector<8x896xbf16>, vector<128x896xf32> -> vector<128x896xf32>
    %c0_3 = arith.constant 0 : index
    %c0_4 = arith.constant 0 : index
    %3 = vector.load %arg3[%c0_3, %c0_4] : memref<1x896xf32, #tpu.memory_space<vmem>>, vector<1x896xf32>
    %4 = vector.broadcast %3 : vector<1x896xf32> to vector<128x896xf32>
    %5 = arith.addf %2, %4 : vector<128x896xf32>
    %cst_5 = arith.constant 0.000000e+00 : f32
    %6 = vector.broadcast %cst_5 : f32 to vector<128x896xf32>
    %7 = arith.maximumf %5, %6 : vector<128x896xf32>
    %8 = arith.truncf %7 : vector<128x896xf32> to vector<128x896xbf16>
    %c0_6 = arith.constant 0 : index
    %c0_7 = arith.constant 0 : index
    %9 = vector.load %arg4[%c0_6, %c0_7] : memref<896x256xbf16, #tpu.memory_space<vmem>>, vector<896x256xbf16>
    %cst_8 = arith.constant dense<0.000000e+00> : vector<128x256xf32>
    %10 = tpu.matmul %8, %9, %cst_8 {dimension_numbers = #tpu.dot_dimension_numbers<[1], [0], [0], [1], [0, 0, 1, 1], [], []>} : vector<128x896xbf16>, vector<896x256xbf16>, vector<128x256xf32> -> vector<128x256xf32>
    %c0_9 = arith.constant 0 : index
    %c0_10 = arith.constant 0 : index
    %11 = vector.load %arg5[%c0_9, %c0_10] : memref<1x256xf32, #tpu.memory_space<vmem>>, vector<1x256xf32>
    %12 = vector.broadcast %11 : vector<1x256xf32> to vector<128x256xf32>
    %13 = arith.addf %10, %12 : vector<128x256xf32>
    %cst_11 = arith.constant 0.000000e+00 : f32
    %14 = vector.broadcast %cst_11 : f32 to vector<128x256xf32>
    %15 = arith.maximumf %13, %14 : vector<128x256xf32>
    %16 = arith.truncf %15 : vector<128x256xf32> to vector<128x256xbf16>
    %c0_12 = arith.constant 0 : index
    %c0_13 = arith.constant 0 : index
    %17 = vector.load %arg6[%c0_12, %c0_13] : memref<256x128xbf16, #tpu.memory_space<vmem>>, vector<256x128xbf16>
    %cst_14 = arith.constant dense<0.000000e+00> : vector<128x128xf32>
    %18 = tpu.matmul %16, %17, %cst_14 {dimension_numbers = #tpu.dot_dimension_numbers<[1], [0], [0], [1], [0, 0, 1, 1], [], []>} : vector<128x256xbf16>, vector<256x128xbf16>, vector<128x128xf32> -> vector<128x128xf32>
    %c0_15 = arith.constant 0 : index
    %c0_16 = arith.constant 0 : index
    %19 = vector.load %arg7[%c0_15, %c0_16] : memref<1x128xf32, #tpu.memory_space<vmem>>, vector<1x128xf32>
    %20 = vector.broadcast %19 : vector<1x128xf32> to vector<128x128xf32>
    %21 = arith.addf %18, %20 : vector<128x128xf32>
    %c0_17 = arith.constant 0 : index
    %c0_18 = arith.constant 0 : index
    %22 = vector.load %arg8[%c0_17, %c0_18] : memref<128x128xf32, #tpu.memory_space<vmem>>, vector<128x128xf32>
    tpu.vector_store %arg8[%c0_17, %c0_18], %21 {strides = array<i32>} : memref<128x128xf32, #tpu.memory_space<vmem>>, vector<128x128xf32>,
    return
  }
  func.func @transform_0(%arg0: i32) -> (i32, i32) {
    %c0_i32 = arith.constant 0 : i32
    %c0_i32_0 = arith.constant 0 : i32
    return %arg0, %c0_i32 : i32, i32
  }
  func.func @transform_1(%arg0: i32) -> (i32, i32) {
    %c0_i32 = arith.constant 0 : i32
    %c0_i32_0 = arith.constant 0 : i32
    %c0_i32_1 = arith.constant 0 : i32
    return %c0_i32, %c0_i32_0 : i32, i32
  }
  func.func @transform_2(%arg0: i32) -> (i32, i32) {
    %c0_i32 = arith.constant 0 : i32
    %c0_i32_0 = arith.constant 0 : i32
    %c0_i32_1 = arith.constant 0 : i32
    return %c0_i32, %c0_i32_0 : i32, i32
  }
  func.func @transform_3(%arg0: i32) -> (i32, i32) {
    %c0_i32 = arith.constant 0 : i32
    %c0_i32_0 = arith.constant 0 : i32
    %c0_i32_1 = arith.constant 0 : i32
    return %c0_i32, %c0_i32_0 : i32, i32
  }
  func.func @transform_4(%arg0: i32) -> (i32, i32) {
    %c0_i32 = arith.constant 0 : i32
    %c0_i32_0 = arith.constant 0 : i32
    %c0_i32_1 = arith.constant 0 : i32
    return %c0_i32, %c0_i32_0 : i32, i32
  }
  func.func @transform_5(%arg0: i32) -> (i32, i32) {
    %c0_i32 = arith.constant 0 : i32
    %c0_i32_0 = arith.constant 0 : i32
    %c0_i32_1 = arith.constant 0 : i32
    return %c0_i32, %c0_i32_0 : i32, i32
  }
  func.func @transform_6(%arg0: i32) -> (i32, i32) {
    %c0_i32 = arith.constant 0 : i32
    %c0_i32_0 = arith.constant 0 : i32
    %c0_i32_1 = arith.constant 0 : i32
    return %c0_i32, %c0_i32_0 : i32, i32
  }
  func.func @transform_7(%arg0: i32) -> (i32, i32) {
    %c0_i32 = arith.constant 0 : i32
    %c0_i32_0 = arith.constant 0 : i32
    return %arg0, %c0_i32 : i32, i32
  }
}

</mosaic_0001>

<bundles_post_ra>
// kernel: tpu_custom_call.1
= control target key start
LH: loop header
LB: loop body
LE: loop exit
PB: predicated region body
PF: predicated region fallthrough
CT: control target
= control target key end

     0   :  { %12 = vsyncpa [#allocation3], 0  ;;  %s4188_s0 = inlined_call_operand.vmem [shape: bf16[128,8], index: 0, kind: input, shape index: {}]   ;;  %s4189_s1 = inlined_call_operand.vmem [shape: bf16[8,896], index: 1, kind: input, shape index: {}]   ;;  %s4190_s2 = inlined_call_operand.vmem [shape: f32[1,896], index: 2, kind: input, shape index: {}]   ;;  %s4191_s3 = inlined_call_operand.hbm [shape: bf16[896,256], index: 3, kind: input, shape index: {}]   ;;  %s4192_s4 = inlined_call_operand.vmem [shape: f32[1,256], index: 4, kind: input, shape index: {}]   ;;  %s4193_s5 = inlined_call_operand.hbm [shape: bf16[256,128], index: 5, kind: input, shape index: {}]   ;;  %s4194_s6 = inlined_call_operand.vmem [shape: f32[1,128], index: 6, kind: input, shape index: {}]   ;;  %s4195_s7 = inlined_call_operand.hbm [shape: f32[128,128], index: 7, kind: output, shape index: {}]  }
   0x1   :  { %13 = vsyncpa [#allocation6], 0 }
   0x2   :  { %14 = vsyncpa [#allocation4], 0  ;;  %s25_s26 = sshll.u32 %s4191_s3, 4  ;;  %s3217_s27 = smov [#allocation2]   ;;  %s26_s26 = int_to_ptr.hbm [resolvable:$true] %s25_s26 }
   0x3   :  { %s27_s28 = sshll.u32 %s3217_s27, 4  ;;  %s40_s8 = sshll.u32 %s4193_s5, 4  ;;  %s28_s28 = int_to_ptr.vmem [resolvable:$true] %s27_s28  ;;  %s41_s8 = int_to_ptr.hbm [resolvable:$true] %s40_s8 }
   0x4   :  { %s3218_s9 = smov 128   ;;  %s3219_s10 = smov 8  }
   0x5   :  { %33 = dma.hbm_to_vmem [thread:$0]  %s26_s26, 14336, %s28_s28, [#allocation3], %s3218_s9, %s3218_s9, %s3219_s10  }
   0x6   :  { %s3220_s11 = smov [#allocation5]   ;;  %s3221_s13 = smov 64  }
   0x7   :  { %s42_s12 = sshll.u32 %s3220_s11, 4  ;;  %s3222_s3 = smov 4   ;;  %s43_s12 = int_to_ptr.vmem [resolvable:$true] %s42_s12 }
   0x8   :  { %48 = dma.hbm_to_vmem [thread:$0]  %s41_s8, 2048, %s43_s12, [#allocation6], %s3221_s13, %s3221_s13, %s3222_s3  }
   0x9   :  { %3211 = dma.done.wait [#allocation3], 14336  }
   0xa   :  { %3212 = vsyncadd [#allocation3], 4294952960 }
   0xb   :  { %3213 = dma.done.wait [#allocation6], 2048  }
   0xc   :  { %3214 = vsyncadd [#allocation6], 4294965248  ;;  %v76_v0 = vld [vmem:[%s4189_s1] sm:$0xff]  ;;  %v78_v3 = vld [vmem:[%s4189_s1 + $0x10] sm:$0xff]  ;;  %vm179_vm0 = vcmask 1043456   ;;  %vm154_vm1 = vcmask 64512  }
   0xd   :  { %v140_v1 = vunpack.c.l.b16 %v76_v0  ;;  %v141_v2 = vunpack.c.h.b16 %v76_v0  ;;  %v77_v4 = vld [vmem:[%s4189_s1 + $0x8] sm:$0xff]  ;;  %v144_v5 = vunpack.c.l.b16 %v78_v3  ;;  %v3287_v13 = vld [vmem:[%s4188_s0] sm:$0xff]  ;;  %v3292_v14 = vld [vmem:[%s4188_s0 + $0x30] sm:$0xff]  ;;  %v145_v24 = vunpack.c.h.b16 %v78_v3  ;;  %s2376_s23 = sshll.u32 %s4195_s7, 4  ;;  %s2377_s23 = int_to_ptr.hbm [resolvable:$true] %s2376_s23 }
   0xe   :  { %v142_v6 = vunpack.c.l.b16 %v77_v4  ;;  %v3307_v17 = vld [vmem:[%s4188_s0 + $0x8] sm:$0xff]  ;;  %v3312_v18 = vld [vmem:[%s4188_s0 + $0x38] sm:$0xff]  ;;  %v3325_v19 = vld [vmem:[%s4188_s0 + $0x10] sm:$0xff]  ;;  %v143_v20 = vunpack.c.h.b16 %v77_v4 }
   0xf   :  { %v147_v7 = vpack.c.b16 %v140_v1, %v140_v1  ;;  %v148_v8 = vpack.c.b16 %v141_v2, %v141_v2  ;;  %v151_v9 = vpack.c.b16 %v144_v5, %v144_v5  ;;  %v3339_v23 = vld [vmem:[%s4188_s0 + $0x18] sm:$0xff]  ;;  %v152_v25 = vpack.c.b16 %v145_v24, %v145_v24  ;;  %v3353_v27 = vld [vmem:[%s4188_s0 + $0x20] sm:$0xff]  ;;  %v2536_v28 = vld [vmem:[#allocation2 + $0x70] sm:$0xf] }
  0x10   :  { %v149_v10 = vpack.c.b16 %v142_v6, %v142_v6  ;;  %v150_v21 = vpack.c.b16 %v143_v20, %v143_v20  ;;  %v3013_v29 = vld [vmem:[#allocation2 + $0x74] sm:$0xf0]  ;;  %v2600_v30 = vld [vmem:[#allocation2 + $0xf0] sm:$0xf]  ;;  %v3370_v38 = vld [vmem:[%s4188_s0 + $0x28] sm:$0xff] }
  0x11   :  { %v181_v11 = vsel %vm179_vm0, %v147_v7, 0  ;;  %v184_v12 = vsel %vm179_vm0, %v148_v8, 0  ;;  %v193_v15 = vsel %vm179_vm0, %v151_v9, 0  ;;  %v196_v26 = vsel %vm179_vm0, %v152_v25, 0  ;;  %v3029_v32 = vld [vmem:[#allocation2 + $0xf4] sm:$0xf0] }
  0x12   :  { %208 = vmatpush.bf16.msra.mxu0 %v181_v11  ;;  %3126 = vmatpush.bf16.msra.mxu3 %v181_v11  ;;  %v187_v16 = vsel %vm179_vm0, %v149_v10, 0  ;;  %v190_v22 = vsel %vm179_vm0, %v150_v21, 0  ;;  %v2537_v31 = vor.u32 %v3013_v29, %v2536_v28  ;;  %v79_v33 = vld [vmem:[%s4189_s1 + $0x18] sm:$0xf]  ;;  %v2601_v34 = vor.u32 %v3029_v32, %v2600_v30  ;;  %v2528_v39 = vld [vmem:[#allocation2 + $0x60] sm:$0xf] }
  0x13   :  { %257 = vmatpush.bf16.msra.mxu1 %v184_v12  ;;  %306 = vmatpush.bf16.msra.mxu2 %v187_v16  ;;  %v146_v35 = vunpack.c.l.b16 %v79_v33  ;;  %v3011_v40 = vld [vmem:[#allocation2 + $0x64] sm:$0xf0]  ;;  %v2592_v41 = vld [vmem:[#allocation2 + $0xe0] sm:$0xf]  ;;  %v2520_v45 = vld [vmem:[#allocation2 + $0x50] sm:$0xf] }
  0x14   :  { %v2529_v42 = vor.u32 %v3011_v40, %v2528_v39  ;;  %v3027_v43 = vld [vmem:[#allocation2 + $0xe4] sm:$0xf0]  ;;  %v3009_v46 = vld [vmem:[#allocation2 + $0x54] sm:$0xf0]  ;;  %v2584_v48 = vld [vmem:[#allocation2 + $0xd0] sm:$0xf] }
  0x15   :  { %2422 = vmatmul.msk.bf16.vlgmr.msra.gmra.mxu0 %vm154_vm1, %v3287_v13  ;;  %2428 = vmatmul.msk.bf16.vlgmr.msra.gmra.mxu3 %vm154_vm1, %v3292_v14  ;;  %v153_v36 = vpack.c.b16 %v146_v35, %v146_v35  ;;  %v2593_v44 = vor.u32 %v3027_v43, %v2592_v41  ;;  %v2521_v47 = vor.u32 %v3009_v46, %v2520_v45  ;;  %v3025_v49 = vld [vmem:[#allocation2 + $0xd4] sm:$0xf0]  ;;  %v2512_v51 = vld [vmem:[#allocation2 + $0x40] sm:$0xf]  ;;  %v3007_v52 = vld [vmem:[#allocation2 + $0x44] sm:$0xf0] }
  0x16   :  { %3127 = vmatpush.bf16.msrb.mxu3 %v184_v12  ;;  %404 = vmatpush.bf16.msrb.mxu0 %v193_v15  ;;  %v2585_v50 = vor.u32 %v3025_v49, %v2584_v48  ;;  %v2513_v53 = vor.u32 %v3007_v52, %v2512_v51  ;;  %v2576_v54 = vld [vmem:[#allocation2 + $0xc0] sm:$0xf]  ;;  %v3023_v55 = vld [vmem:[#allocation2 + $0xc4] sm:$0xf0]  ;;  %v2504_v61 = vld [vmem:[#allocation2 + $0x30] sm:$0xf] }
  0x17   :  { %2430 = vmatmul.msk.bf16.vlgmr.msra.gmra.mxu1 %vm154_vm1, %v3287_v13  ;;  %2438 = vmatmul.msk.bf16.vlgmr.msra.gmra.mxu2 %vm154_vm1, %v3287_v13  ;;  %v199_v37 = vsel %vm179_vm0, %v153_v36, 0  ;;  %v2577_v56 = vor.u32 %v3023_v55, %v2576_v54  ;;  %v3399_v57 = vld [vmem:[%s4190_s2] sm:$0xff]  ;;  %v3005_v62 = vld [vmem:[#allocation2 + $0x34] sm:$0xf0]  ;;  %v2568_v8 = vld [vmem:[#allocation2 + $0xb0] sm:$0xf] }
  0x18   :  { %453 = vmatpush.bf16.msrb.mxu1 %v196_v26  ;;  %502 = vmatpush.bf16.msrb.mxu2 %v199_v37  ;;  %v3404_v60 = vperm.slane %v3399_v57, 0  ;;  %v2505_v0 = vor.u32 %v3005_v62, %v2504_v61  ;;  %v3021_v9 = vld [vmem:[#allocation2 + $0xb4] sm:$0xf0]  ;;  %v2496_v24 = vld [vmem:[#allocation2 + $0x20] sm:$0xf] }
  0x19   :  { %v2569_v12 = vor.u32 %v3021_v9, %v2568_v8  ;;  %v3003_v25 = vld [vmem:[#allocation2 + $0x24] sm:$0xf0]  ;;  %v2560_v36 = vld [vmem:[#allocation2 + $0xa0] sm:$0xf]  ;;  %v2664_v48 = vld [vmem:[#allocation2 + $0x170] sm:$0xf] }
  0x1a   :  { %3128 = vmatpush.bf16.msra.mxu3 %v187_v16  ;;  %1439 = vmatpush.bf16.msra.mxu0 %v2601_v34  ;;  %v2497_v28 = vor.u32 %v3003_v25, %v2496_v24  ;;  %v3019_v37 = vld [vmem:[#allocation2 + $0xa4] sm:$0xf0]  ;;  %v3045_v49 = vld [vmem:[#allocation2 + $0x174] sm:$0xf0]  ;;  %v2488_v52 = vld [vmem:[#allocation2 + $0x10] sm:$0xf] }
  0x1b   :  { %v2561_v40 = vor.u32 %v3019_v37, %v2560_v36  ;;  %v3043_v61 = vld [vmem:[#allocation2 + $0x164] sm:$0xf0]  ;;  %v3037_v36 = vld [vmem:[#allocation2 + $0x134] sm:$0xf0] }
  0x1c   :  { %v3039_v24 = vld [vmem:[#allocation2 + $0x144] sm:$0xf0] }
  0x1e   :  { %1440 = vmatpush.bf16.msra.mxu0 %v2593_v44 }
  0x22   :  { %1441 = vmatpush.bf16.msra.mxu0 %v2585_v50  ;;  %v2665_v50 = vor.u32 %v3045_v49, %v2664_v48 }
  0x24   :  { %1488 = vmatpush.bf16.msra.mxu1 %v2665_v50  ;;  %v2624_v50 = vld [vmem:[#allocation2 + $0x120] sm:$0xf] }
  0x25   :  { %2423 = vmatmul.msk.bf16.gmra.mxu0 %vm154_vm1, %v3307_v17  ;;  %2429 = vmatmul.msk.bf16.gmra.mxu3 %vm154_vm1, %v3312_v18 }
  0x26   :  { %1442 = vmatpush.bf16.msra.mxu0 %v2577_v56 }
  0x27   :  { %2431 = vmatmul.msk.bf16.gmra.mxu1 %vm154_vm1, %v3307_v17  ;;  %2439 = vmatmul.msk.bf16.gmra.mxu2 %vm154_vm1, %v3307_v17 }
  0x2a   :  { %1443 = vmatpush.bf16.msra.mxu0 %v2569_v12  ;;  %v3017_v12 = vld [vmem:[#allocation2 + $0x94] sm:$0xf0] }
  0x2e   :  { %1444 = vmatpush.bf16.msra.mxu0 %v2561_v40  ;;  %v2480_v40 = vld [vmem:[#allocation2] sm:$0xf] }
  0x35   :  { %2424 = vmatmul.msk.bf16.gmra.mxu0 %vm154_vm1, %v3325_v19  ;;  %2436 = vmatmul.msk.bf16.vlgmr.msrb.gmra.mxu3 %vm154_vm1, %v3292_v14 }
  0x36   :  { %355 = vmatpush.bf16.msrb.mxu3 %v190_v22 }
  0x37   :  { %2432 = vmatmul.msk.bf16.gmra.mxu1 %vm154_vm1, %v3325_v19  ;;  %2440 = vmatmul.msk.bf16.gmra.mxu2 %vm154_vm1, %v3325_v19 }
  0x45   :  { %2425 = vmatmul.msk.bf16.gmra.mxu0 %vm154_vm1, %v3339_v23  ;;  %2437 = vmatmul.msk.bf16.gmra.mxu3 %vm154_vm1, %v3312_v18 }
  0x47   :  { %2433 = vmatmul.msk.bf16.gmra.mxu1 %vm154_vm1, %v3339_v23  ;;  %2441 = vmatmul.msk.bf16.gmra.mxu2 %vm154_vm1, %v3339_v23 }
  0x55   :  { %2426 = vmatmul.msk.bf16.gmra.mxu0 %vm154_vm1, %v3353_v27  ;;  %2444 = vmatmul.msk.bf16.vlgmr.msra.gmra.mxu3 %vm154_vm1, %v3292_v14 }
  0x56   :  { %1390 = vmatpush.bf16.msra.mxu3 %v2537_v31 }
  0x57   :  { %2434 = vmatmul.msk.bf16.gmra.mxu1 %vm154_vm1, %v3353_v27  ;;  %2442 = vmatmul.msk.bf16.gmra.mxu2 %vm154_vm1, %v3353_v27 }
  0x5a   :  { %1391 = vmatpush.bf16.msra.mxu3 %v2529_v42 }
  0x5e   :  { %1392 = vmatpush.bf16.msra.mxu3 %v2521_v47 }
  0x62   :  { %1393 = vmatpush.bf16.msra.mxu3 %v2513_v53  ;;  %v3001_v53 = vld [vmem:[#allocation2 + $0x14] sm:$0xf0] }
  0x63   :  { %v2489_v55 = vor.u32 %v3001_v53, %v2488_v52  ;;  %v3035_v52 = vld [vmem:[#allocation2 + $0x124] sm:$0xf0] }
  0x64   :  { %v2625_v53 = vor.u32 %v3035_v52, %v2624_v50  ;;  %v2696_v52 = vld [vmem:[#allocation2 + $0x1b0] sm:$0xf] }
  0x65   :  { %2427 = vmatmul.msk.bf16.gmra.mxu0 %vm154_vm1, %v3370_v38  ;;  %2445 = vmatmul.msk.bf16.gmra.mxu3 %vm154_vm1, %v3312_v18 }
  0x66   :  { %1394 = vmatpush.bf16.msra.mxu3 %v2505_v0 }
  0x67   :  { %2435 = vmatmul.msk.bf16.gmra.mxu1 %vm154_vm1, %v3370_v38  ;;  %2443 = vmatmul.msk.bf16.gmra.mxu2 %vm154_vm1, %v3370_v38 }
  0x6a   :  { %1395 = vmatpush.bf16.msra.mxu3 %v2497_v28 }
  0x6e   :  { %1396 = vmatpush.bf16.msra.mxu3 %v2489_v55 }
  0x75   :  { %2446 = vmatmul.msk.bf16.vlgmr.msrb.gmra.mxu3 %vm154_vm1, %v3287_v13  ;;  %2454 = vmatmul.msk.bf16.vlgmr.msrb.gmra.mxu0 %vm154_vm1, %v3287_v13 }
  0x77   :  { %2462 = vmatmul.msk.bf16.vlgmr.msrb.gmra.mxu1 %vm154_vm1, %v3287_v13  ;;  %2470 = vmatmul.msk.bf16.vlgmr.msrb.gmra.mxu2 %vm154_vm1, %v3287_v13 }
  0x85   :  { %2447 = vmatmul.msk.bf16.gmra.mxu3 %vm154_vm1, %v3307_v17  ;;  %2455 = vmatmul.msk.bf16.gmra.mxu0 %vm154_vm1, %v3307_v17 }
  0x87   :  { %2463 = vmatmul.msk.bf16.gmra.mxu1 %vm154_vm1, %v3307_v17  ;;  %2471 = vmatmul.msk.bf16.gmra.mxu2 %vm154_vm1, %v3307_v17 }
  0x92   :  { %v210_v58 = vpop.f32.mrf.mxu0 }
  0x93   :  { %v211_v63 = vadd.f32 %v210_v58, %v3404_v60  ;;  %v2656_v58 = vld [vmem:[#allocation2 + $0x160] sm:$0xf] }
  0x94   :  { %v3401_v59 = vpop.f32.mrf.mxu1  ;;  %v2657_v62 = vor.u32 %v3043_v61, %v2656_v58  ;;  %v3059_v58 = vld [vmem:[#allocation2 + $0x1e4] sm:$0xf0] }
  0x95   :  { %2448 = vmatmul.msk.bf16.gmra.mxu3 %vm154_vm1, %v3325_v19  ;;  %2456 = vmatmul.msk.bf16.gmra.mxu0 %vm154_vm1, %v3325_v19  ;;  %v544_v4 = vmax.f32 %v211_v63, 0.0 }
  0x96   :  { %1489 = vmatpush.bf16.msra.mxu1 %v2657_v62 }
  0x97   :  { %2464 = vmatmul.msk.bf16.gmra.mxu1 %vm154_vm1, %v3325_v19  ;;  %2472 = vmatmul.msk.bf16.gmra.mxu2 %vm154_vm1, %v3325_v19 }
  0x98   :  { %v240_v1 = vpop.f32.mrf.mxu3 }
  0x99   :  { %v241_v10 = vadd.f32 %v240_v1, %v3404_v60  ;;  %v3466_v1 = vperm.slane %v3399_v57, 1 }
  0x9a   :  { %v212_v2 = vpop.f32.mrf.mxu0  ;;  %v3415_v3 = vpop.f32.mrf.mxu2 }
  0x9b   :  { %v213_v5 = vadd.f32 %v212_v2, %v3404_v60  ;;  %v628_v19 = vmax.f32 %v241_v10, 0.0  ;;  %v2552_v10 = vld [vmem:[#allocation2 + $0x90] sm:$0xf] }
  0x9c   :  { %v3418_v6 = vpop.f32.mrf.mxu1 }
  0x9d   :  { %v551_v7 = vmax.f32 %v213_v5, 0.0 }
  0x9f   :  { %v3421_v11 = vpack.c.bf16 %v551_v7, %v544_v4  ;;  %v3041_v7 = vld [vmem:[#allocation2 + $0x154] sm:$0xf0] }
  0xa0   :  { %v242_v13 = vpop.f32.mrf.mxu3 }
  0xa1   :  { %v243_v15 = vadd.f32 %v242_v13, %v3404_v60 }
  0xa2   :  { %v215_v16 = vpop.f32.mrf.mxu0  ;;  %v3424_v17 = vpop.f32.mrf.mxu2 }
  0xa3   :  { %v635_v20 = vmax.f32 %v243_v15, 0.0  ;;  %v216_v26 = vadd.f32 %v215_v16, %v3404_v60  ;;  %v2553_v15 = vor.u32 %v3017_v12, %v2552_v10 }
  0xa4   :  { %v3426_v21 = vpop.f32.mrf.mxu1 }
  0xa5   :  { %2449 = vmatmul.msk.bf16.gmra.mxu3 %vm154_vm1, %v3339_v23  ;;  %2457 = vmatmul.msk.bf16.gmra.mxu0 %vm154_vm1, %v3339_v23  ;;  %v3432_v22 = vpack.c.bf16 %v635_v20, %v628_v19  ;;  %v558_v32 = vmax.f32 %v216_v26, 0.0  ;;  %v2640_v20 = vld [vmem:[#allocation2 + $0x140] sm:$0xf] }
  0xa6   :  { %1445 = vmatpush.bf16.msra.mxu0 %v2553_v15  ;;  %v2641_v26 = vor.u32 %v3039_v24, %v2640_v20  ;;  %v3057_v15 = vld [vmem:[#allocation2 + $0x1d4] sm:$0xf0] }
  0xa7   :  { %4225 = vst [vmem:[#allocation11_spill] sm:$0xff] %v3432_v22  ;;  %2465 = vmatmul.msk.bf16.gmra.mxu1 %vm154_vm1, %v3339_v23  ;;  %2473 = vmatmul.msk.bf16.gmra.mxu2 %vm154_vm1, %v3339_v23 }
  0xa8   :  { %v245_v29 = vpop.f32.mrf.mxu3 }
  0xa9   :  { %v246_v39 = vadd.f32 %v245_v29, %v3404_v60 }
  0xaa   :  { %v217_v30 = vpop.f32.mrf.mxu0  ;;  %v3439_v31 = vpop.f32.mrf.mxu2 }
  0xab   :  { %v218_v33 = vadd.f32 %v217_v30, %v3404_v60  ;;  %v642_v45 = vmax.f32 %v246_v39, 0.0 }
  0xac   :  { %v3442_v34 = vpop.f32.mrf.mxu1 }
  0xad   :  { %v565_v35 = vmax.f32 %v218_v33, 0.0 }
  0xaf   :  { %v3445_v41 = vpack.c.bf16 %v565_v35, %v558_v32  ;;  %v2632_v35 = vld [vmem:[#allocation2 + $0x130] sm:$0xf] }
  0xb0   :  { %v247_v23 = vpop.f32.mrf.mxu3  ;;  %v2633_v37 = vor.u32 %v3037_v36, %v2632_v35  ;;  %v2704_v36 = vld [vmem:[#allocation2 + $0x1c0] sm:$0xf] }
  0xb1   :  { %v248_v42 = vadd.f32 %v247_v23, %v3404_v60  ;;  %v2999_v23 = vld [vmem:[#allocation2 + $0x4] sm:$0xf0] }
  0xb2   :  { %v220_v43 = vpop.f32.mrf.mxu0  ;;  %v3448_v44 = vpop.f32.mrf.mxu2 }
  0xb3   :  { %v649_v46 = vmax.f32 %v248_v42, 0.0  ;;  %v221_v54 = vadd.f32 %v220_v43, %v3404_v60  ;;  %v2481_v43 = vor.u32 %v2999_v23, %v2480_v40 }
  0xb4   :  { %v3450_v47 = vpop.f32.mrf.mxu1 }
  0xb5   :  { %2450 = vmatmul.msk.bf16.gmra.mxu3 %vm154_vm1, %v3353_v27  ;;  %2458 = vmatmul.msk.bf16.gmra.mxu0 %vm154_vm1, %v3353_v27  ;;  %v3456_v51 = vpack.c.bf16 %v649_v46, %v642_v45  ;;  %v572_v2 = vmax.f32 %v221_v54, 0.0  ;;  %v2728_v45 = vld [vmem:[#allocation2 + $0x1f0] sm:$0xf]  ;;  %v3061_v46 = vld [vmem:[#allocation2 + $0x1f4] sm:$0xf0] }
  0xb6   :  { %v2729_v49 = vor.u32 %v3061_v46, %v2728_v45  ;;  %1397 = vmatpush.bf16.msra.mxu3 %v2481_v43  ;;  %v2792_v46 = vld [vmem:[#allocation2 + $0x270] sm:$0xf] }
  0xb7   :  { %4226 = vst [vmem:[#allocation12_spill] sm:$0xff] %v3456_v51  ;;  %2466 = vmatmul.msk.bf16.gmra.mxu1 %vm154_vm1, %v3353_v27  ;;  %2474 = vmatmul.msk.bf16.gmra.mxu2 %vm154_vm1, %v3353_v27  ;;  %v2648_v27 = vld [vmem:[#allocation2 + $0x150] sm:$0xf] }
  0xb8   :  { %v289_v56 = vpop.f32.mrf.mxu3  ;;  %v2649_v9 = vor.u32 %v3041_v7, %v2648_v27  ;;  %1537 = vmatpush.bf16.msra.mxu2 %v2729_v49 }
  0xb9   :  { %v290_v13 = vadd.f32 %v289_v56, %v3466_v1  ;;  %v2720_v56 = vld [vmem:[#allocation2 + $0x1e0] sm:$0xf] }
  0xba   :  { %v222_v63 = vpop.f32.mrf.mxu0  ;;  %v3463_v0 = vpop.f32.mrf.mxu2  ;;  %1490 = vmatpush.bf16.msra.mxu1 %v2649_v9  ;;  %v3015_v9 = vld [vmem:[#allocation2 + $0x84] sm:$0xf0] }
  0xbb   :  { %v223_v4 = vadd.f32 %v222_v63, %v3404_v60  ;;  %v629_v30 = vmax.f32 %v290_v13, 0.0  ;;  %v2721_v63 = vor.u32 %v3059_v58, %v2720_v56  ;;  %v2712_v13 = vld [vmem:[#allocation2 + $0x1d0] sm:$0xf] }
  0xbc   :  { %v3469_v5 = vpop.f32.mrf.mxu1  ;;  %v2713_v24 = vor.u32 %v3057_v15, %v2712_v13 }
  0xbd   :  { %v579_v8 = vmax.f32 %v223_v4, 0.0  ;;  %v3033_v4 = vld [vmem:[#allocation2 + $0x114] sm:$0xf0]  ;;  %1538 = vmatpush.bf16.msra.mxu2 %v2721_v63  ;;  %v3051_v63 = vld [vmem:[#allocation2 + $0x1a4] sm:$0xf0] }
  0xbe   :  { %1491 = vmatpush.bf16.msra.mxu1 %v2641_v26  ;;  %v3031_v26 = vld [vmem:[#allocation2 + $0x104] sm:$0xf0] }
  0xbf   :  { %v3472_v16 = vpack.c.bf16 %v579_v8, %v572_v2  ;;  %v2616_v2 = vld [vmem:[#allocation2 + $0x110] sm:$0xf]  ;;  %v2544_v8 = vld [vmem:[#allocation2 + $0x80] sm:$0xf] }
  0xc0   :  { %v291_v19 = vpop.f32.mrf.mxu3  ;;  %v2617_v7 = vor.u32 %v3033_v4, %v2616_v2  ;;  %v2545_v12 = vor.u32 %v3015_v9, %v2544_v8  ;;  %v3517_v2 = vperm.slane %v3399_v57, 2  ;;  %v2680_v9 = vld [vmem:[#allocation2 + $0x190] sm:$0xf] }
  0xc1   :  { %v292_v25 = vadd.f32 %v291_v19, %v3466_v1  ;;  %1539 = vmatpush.bf16.msra.mxu2 %v2713_v24  ;;  %v2856_v24 = vld [vmem:[#allocation2 + $0x2f0] sm:$0xf] }
  0xc2   :  { %v225_v28 = vpop.f32.mrf.mxu0  ;;  %v3475_v29 = vpop.f32.mrf.mxu2  ;;  %1492 = vmatpush.bf16.msra.mxu1 %v2633_v37  ;;  %1446 = vmatpush.bf16.msra.mxu0 %v2545_v12  ;;  %v3055_v37 = vld [vmem:[#allocation2 + $0x1c4] sm:$0xf0] }
  0xc3   :  { %v636_v32 = vmax.f32 %v292_v25, 0.0  ;;  %v226_v42 = vadd.f32 %v225_v28, %v3404_v60  ;;  %v2608_v25 = vld [vmem:[#allocation2 + $0x100] sm:$0xf]  ;;  %v2705_v43 = vor.u32 %v3055_v37, %v2704_v36  ;;  %v3047_v37 = vld [vmem:[#allocation2 + $0x184] sm:$0xf0] }
  0xc4   :  { %v3477_v33 = vpop.f32.mrf.mxu1  ;;  %v2672_v36 = vld [vmem:[#allocation2 + $0x180] sm:$0xf] }
  0xc5   :  { %2451 = vmatmul.msk.bf16.gmra.mxu3 %vm154_vm1, %v3370_v38  ;;  %2459 = vmatmul.msk.bf16.gmra.mxu0 %vm154_vm1, %v3370_v38  ;;  %v3483_v39 = vpack.c.bf16 %v636_v32, %v629_v30  ;;  %v586_v61 = vmax.f32 %v226_v42, 0.0  ;;  %v2609_v30 = vor.u32 %v3031_v26, %v2608_v25  ;;  %v3093_v25 = vld [vmem:[#allocation2 + $0x2f4] sm:$0xf0] }
  0xc6   :  { %1493 = vmatpush.bf16.msra.mxu1 %v2625_v53  ;;  %1540 = vmatpush.bf16.msra.mxu2 %v2705_v43  ;;  %v3053_v53 = vld [vmem:[#allocation2 + $0x1b4] sm:$0xf0] }
  0xc7   :  { %4227 = vst [vmem:[#allocation13_spill] sm:$0xff] %v3483_v39  ;;  %2467 = vmatmul.msk.bf16.gmra.mxu1 %vm154_vm1, %v3370_v38  ;;  %2475 = vmatmul.msk.bf16.gmra.mxu2 %vm154_vm1, %v3370_v38  ;;  %v2697_v56 = vor.u32 %v3053_v53, %v2696_v52 }
  0xc8   :  { %v294_v48 = vpop.f32.mrf.mxu3 }
  0xc9   :  { %v295_v10 = vadd.f32 %v294_v48, %v3466_v1  ;;  %v3077_v48 = vld [vmem:[#allocation2 + $0x274] sm:$0xf0] }
  0xca   :  { %v227_v54 = vpop.f32.mrf.mxu0  ;;  %v3490_v55 = vpop.f32.mrf.mxu2  ;;  %1494 = vmatpush.bf16.msra.mxu1 %v2617_v7  ;;  %v2793_v50 = vor.u32 %v3077_v48, %v2792_v46  ;;  %1541 = vmatpush.bf16.msra.mxu2 %v2697_v56  ;;  %v2673_v46 = vor.u32 %v3047_v37, %v2672_v36  ;;  %v260_v56 = vadd.f32 %v3401_v59, %v3466_v1 }
  0xcb   :  { %v228_v62 = vadd.f32 %v227_v54, %v3404_v60  ;;  %v643_v40 = vmax.f32 %v295_v10, 0.0  ;;  %v3049_v10 = vld [vmem:[#allocation2 + $0x194] sm:$0xf0] }
  0xcc   :  { %v3493_v38 = vpop.f32.mrf.mxu1  ;;  %1586 = vmatpush.bf16.msrb.mxu3 %v2793_v50  ;;  %v2681_v13 = vor.u32 %v3049_v10, %v2680_v9  ;;  %v3075_v50 = vld [vmem:[#allocation2 + $0x264] sm:$0xf0]  ;;  %v545_v9 = vmax.f32 %v260_v56, 0.0 }
  0xcd   :  { %v593_v27 = vmax.f32 %v228_v62, 0.0  ;;  %v2688_v62 = vld [vmem:[#allocation2 + $0x1a0] sm:$0xf] }
  0xce   :  { %1495 = vmatpush.bf16.msra.mxu1 %v2609_v30 }
  0xcf   :  { %v3496_v19 = vpack.c.bf16 %v593_v27, %v586_v61 }
  0xd0   :  { %v296_v20 = vpop.f32.mrf.mxu3 }
  0xd1   :  { %v297_v28 = vadd.f32 %v296_v20, %v3466_v1 }
  0xd2   :  { %v230_v32 = vpop.f32.mrf.mxu0  ;;  %v3499_v35 = vpop.f32.mrf.mxu2 }
  0xd3   :  { %v650_v23 = vmax.f32 %v297_v28, 0.0  ;;  %v231_v49 = vadd.f32 %v230_v32, %v3404_v60  ;;  %v2857_v28 = vor.u32 %v3093_v25, %v2856_v24 }
  0xd4   :  { %v3501_v42 = vpop.f32.mrf.mxu1 }
  0xd5   :  { %2452 = vmatmul.msk.bf16.gmra.mxu3 %vm154_vm1, %v3292_v14  ;;  %2460 = vmatmul.msk.bf16.gmra.mxu0 %vm154_vm1, %v3292_v14  ;;  %v3507_v45 = vpack.c.bf16 %v650_v23, %v643_v40  ;;  %v600_v4 = vmax.f32 %v231_v49, 0.0  ;;  %v2784_v49 = vld [vmem:[#allocation2 + $0x260] sm:$0xf] }
  0xd6   :  { %1635 = vmatpush.bf16.msrb.mxu0 %v2857_v28  ;;  %v2785_v53 = vor.u32 %v3075_v50, %v2784_v49  ;;  %v2776_v50 = vld [vmem:[#allocation2 + $0x250] sm:$0xf] }
  0xd7   :  { %4228 = vst [vmem:[#allocation14_spill] sm:$0xff] %v3507_v45  ;;  %2468 = vmatmul.msk.bf16.gmra.mxu1 %vm154_vm1, %v3292_v14  ;;  %2476 = vmatmul.msk.bf16.gmra.mxu2 %vm154_vm1, %v3292_v14  ;;  %v2689_v14 = vor.u32 %v3051_v63, %v2688_v62  ;;  %v309_v62 = vadd.f32 %v3415_v3, %v3517_v2 }
  0xd8   :  { %v338_v54 = vpop.f32.mrf.mxu3  ;;  %1587 = vmatpush.bf16.msrb.mxu3 %v2785_v53  ;;  %v311_v63 = vadd.f32 %v3424_v17, %v3517_v2 }
  0xd9   :  { %1542 = vmatpush.bf16.msra.mxu2 %v2689_v14  ;;  %v339_v12 = vadd.f32 %v338_v54, %v3517_v2 }
  0xda   :  { %v232_v58 = vpop.f32.mrf.mxu0  ;;  %v3514_v61 = vpop.f32.mrf.mxu2 }
  0xdb   :  { %v233_v27 = vadd.f32 %v232_v58, %v3404_v60  ;;  %v630_v40 = vmax.f32 %v339_v12, 0.0  ;;  %v262_v58 = vadd.f32 %v3418_v6, %v3466_v1  ;;  %v546_v12 = vmax.f32 %v309_v62, 0.0 }
  0xdc   :  { %v3520_v7 = vpop.f32.mrf.mxu1  ;;  %v553_v6 = vmax.f32 %v311_v63, 0.0  ;;  %v267_v62 = vadd.f32 %v3442_v34, %v3466_v1  ;;  %v314_v63 = vadd.f32 %v3439_v31, %v3517_v2  ;;  %v2840_v31 = vld [vmem:[#allocation2 + $0x2d0] sm:$0xf] }
  0xdd   :  { %v607_v8 = vmax.f32 %v233_v27, 0.0  ;;  %1543 = vmatpush.bf16.msra.mxu2 %v2681_v13  ;;  %v552_v59 = vmax.f32 %v262_v58, 0.0  ;;  %v2848_v13 = vld [vmem:[#allocation2 + $0x2e0] sm:$0xf]  ;;  %v265_v58 = vadd.f32 %v3426_v21, %v3466_v1 }
  0xde   :  { %v566_v34 = vmax.f32 %v267_v62, 0.0  ;;  %v3071_v62 = vld [vmem:[#allocation2 + $0x244] sm:$0xf0] }
  0xdf   :  { %v3523_v15 = vpack.c.bf16 %v607_v8, %v600_v4 }
  0xe0   :  { %v340_v20 = vpop.f32.mrf.mxu3 }
  0xe1   :  { %v341_v26 = vadd.f32 %v340_v20, %v3517_v2  ;;  %1544 = vmatpush.bf16.msra.mxu2 %v2673_v46  ;;  %v3091_v20 = vld [vmem:[#allocation2 + $0x2e4] sm:$0xf0] }
  0xe2   :  { %v235_v30 = vpop.f32.mrf.mxu0  ;;  %v3526_v32 = vpop.f32.mrf.mxu2  ;;  %v2849_v24 = vor.u32 %v3091_v20, %v2848_v13  ;;  %v560_v13 = vmax.f32 %v314_v63, 0.0 }
  0xe3   :  { %v637_v23 = vmax.f32 %v341_v26, 0.0  ;;  %v236_v52 = vadd.f32 %v235_v30, %v3404_v60  ;;  %v3557_v26 = vpack.c.bf16 %v552_v59, %v545_v9  ;;  %v3586_v59 = vperm.slane %v3399_v57, 3 }
  0xe4   :  { %v3528_v43 = vpop.f32.mrf.mxu1  ;;  %1636 = vmatpush.bf16.msrb.mxu0 %v2849_v24 }
  0xe5   :  { %2453 = vmatmul.msk.bf16.gmra.mxu3 %vm154_vm1, %v3312_v18  ;;  %2461 = vmatmul.msk.bf16.gmra.mxu0 %vm154_vm1, %v3312_v18  ;;  %v3534_v48 = vpack.c.bf16 %v637_v23, %v630_v40  ;;  %v614_v14 = vmax.f32 %v236_v52, 0.0  ;;  %4230 = vst [vmem:[#allocation16_spill] sm:$0xff] %v3557_v26  ;;  %v3565_v23 = vperm.slane %v3399_v57, 4  ;;  %v3073_v52 = vld [vmem:[#allocation2 + $0x254] sm:$0xf0] }
  0xe7   :  { %4229 = vst [vmem:[#allocation15_spill] sm:$0xff] %v3534_v48  ;;  %2469 = vmatmul.msk.bf16.gmra.mxu1 %vm154_vm1, %v3312_v18  ;;  %2477 = vmatmul.msk.bf16.gmra.mxu2 %vm154_vm1, %v3312_v18 }
  0xe8   :  { %v343_v54 = vpop.f32.mrf.mxu3 }
  0xe9   :  { %v344_v3 = vadd.f32 %v343_v54, %v3517_v2  ;;  %v2777_v54 = vor.u32 %v3073_v52, %v2776_v50 }
  0xea   :  { %v237_v4 = vpop.f32.mrf.mxu0  ;;  %v3549_v27 = vpop.f32.mrf.mxu2 }
  0xeb   :  { %v238_v18 = vadd.f32 %v237_v4, %v3404_v60  ;;  %v3560_v60 = vpack.c.bf16 %v553_v6, %v546_v12  ;;  %v644_v37 = vmax.f32 %v344_v3, 0.0  ;;  %1588 = vmatpush.bf16.msrb.mxu3 %v2777_v54  ;;  %v316_v4 = vadd.f32 %v3448_v44, %v3517_v2  ;;  %v3089_v3 = vld [vmem:[#allocation2 + $0x2d4] sm:$0xf0] }
  0xec   :  { %v3552_v8 = vpop.f32.mrf.mxu1  ;;  %v559_v12 = vmax.f32 %v265_v58, 0.0 }
  0xed   :  { %v621_v10 = vmax.f32 %v238_v18, 0.0  ;;  %4231 = vst [vmem:[#allocation17_spill] sm:$0xff] %v3560_v60  ;;  %v567_v20 = vmax.f32 %v316_v4, 0.0 }
  0xef   :  { %v3555_v25 = vpack.c.bf16 %v621_v10, %v614_v14 }
  0xf0   :  { %v345_v17 = vpop.f32.mrf.mxu3 }
  0xf1   :  { %v346_v28 = vadd.f32 %v345_v17, %v3517_v2  ;;  %v2841_v17 = vor.u32 %v3089_v3, %v2840_v31 }
  0xf2   :  { %v406_v30 = vpop.f32.mrf.mxu0  ;;  %v3562_v36 = vpop.f32.mrf.mxu2 }
  0xf3   :  { %v651_v40 = vmax.f32 %v346_v28, 0.0  ;;  %v407_v53 = vadd.f32 %v406_v30, %v3565_v23  ;;  %v3595_v30 = vpack.c.bf16 %v566_v34, %v559_v12  ;;  %1637 = vmatpush.bf16.msrb.mxu0 %v2841_v17  ;;  %v319_v12 = vadd.f32 %v3463_v0, %v3517_v2 }
  0xf4   :  { %v3567_v46 = vpop.f32.mrf.mxu1  ;;  %v321_v34 = vadd.f32 %v3475_v29, %v3517_v2 }
  0xf5   :  { %1398 = vmatmul.bf16.vlgmr.msra.gmra.mxu3 %v3421_v11  ;;  %1447 = vmatmul.bf16.vlgmr.msra.gmra.mxu0 %v3557_v26  ;;  %v3571_v49 = vpack.c.bf16 %v651_v40, %v644_v37  ;;  %v548_v9 = vmax.f32 %v407_v53, 0.0  ;;  %4233 = vst [vmem:[#allocation19_spill] sm:$0xff] %v3595_v30  ;;  %v3597_v40 = vpack.c.bf16 %v567_v20, %v560_v13 }
  0xf7   :  { %4232 = vst [vmem:[#allocation18_spill] sm:$0xff] %v3571_v49  ;;  %1496 = vmatmul.bf16.vlgmr.msra.gmra.mxu1 %v3560_v60 }
  0xf8   :  { %v357_v56 = vpop.f32.mrf.mxu3  ;;  %4234 = vst [vmem:[#allocation20_spill] sm:$0xff] %v3597_v40 }
  0xf9   :  { %v358_v44 = vadd.f32 %v357_v56, %v3586_v59  ;;  %v2768_v56 = vld [vmem:[#allocation2 + $0x240] sm:$0xf] }
  0xfa   :  { %v408_v14 = vpop.f32.mrf.mxu0  ;;  %v3583_v18 = vpop.f32.mrf.mxu2  ;;  %v2769_v4 = vor.u32 %v3071_v62, %v2768_v56 }
  0xfb   :  { %v409_v10 = vadd.f32 %v408_v14, %v3565_v23  ;;  %v547_v52 = vmax.f32 %v358_v44, 0.0 }
  0xfc   :  { %v3589_v21 = vpop.f32.mrf.mxu1  ;;  %1589 = vmatpush.bf16.msrb.mxu3 %v2769_v4 }
  0xfd   :  { %v555_v6 = vmax.f32 %v409_v10, 0.0  ;;  %v272_v10 = vadd.f32 %v3469_v5, %v3466_v1  ;;  %v581_v5 = vmax.f32 %v321_v34, 0.0 }
  0xff   :  { %v3592_v24 = vpack.c.bf16 %v555_v6, %v548_v9  ;;  %v270_v9 = vadd.f32 %v3450_v47, %v3466_v1  ;;  %v580_v47 = vmax.f32 %v272_v10, 0.0 }
 0x100   :  { %v359_v28 = vpop.f32.mrf.mxu3 }
 0x101   :  { %v360_v57 = vadd.f32 %v359_v28, %v3586_v59  ;;  %v573_v44 = vmax.f32 %v270_v9, 0.0  ;;  %v574_v28 = vmax.f32 %v319_v12, 0.0 }
 0x102   :  { %v411_v37 = vpop.f32.mrf.mxu0  ;;  %v3599_v50 = vpop.f32.mrf.mxu2 }
 0x103   :  { %v554_v53 = vmax.f32 %v360_v57, 0.0  ;;  %v412_v63 = vadd.f32 %v411_v37, %v3565_v23  ;;  %v2832_v57 = vld [vmem:[#allocation2 + $0x2c0] sm:$0xf]  ;;  %v3087_v37 = vld [vmem:[#allocation2 + $0x2c4] sm:$0xf0]  ;;  %v3627_v62 = vpack.c.bf16 %v580_v47, %v573_v44  ;;  %v3629_v4 = vpack.c.bf16 %v581_v5, %v574_v28 }
 0x104   :  { %v3601_v54 = vpop.f32.mrf.mxu1  ;;  %v277_v28 = vadd.f32 %v3493_v38, %v3466_v1  ;;  %v324_v5 = vadd.f32 %v3490_v55, %v3517_v2 }
 0x105   :  { %v3603_v58 = vpack.c.bf16 %v554_v53, %v547_v52  ;;  %1403 = vmatmul.bf16.gmra.mxu3 %v3445_v41  ;;  %1452 = vmatmul.bf16.gmra.mxu0 %v3595_v30  ;;  %v562_v20 = vmax.f32 %v412_v63, 0.0  ;;  %v2833_v52 = vor.u32 %v3087_v37, %v2832_v57  ;;  %4236 = vst [vmem:[#allocation22_spill] sm:$0xff] %v3627_v62  ;;  %v3103_v30 = vld [vmem:[#allocation2 + $0x344] sm:$0xf0] }
 0x106   :  { %4237 = vst [vmem:[#allocation23_spill] sm:$0xff] %v3629_v4  ;;  %v326_v57 = vadd.f32 %v3499_v35, %v3517_v2 }
 0x107   :  { %4235 = vst [vmem:[#allocation21_spill] sm:$0xff] %v3603_v58  ;;  %1501 = vmatmul.bf16.gmra.mxu1 %v3597_v40  ;;  %1545 = vmatmul.bf16.vlgmr.msra.gmra.mxu2 %v3603_v58 }
 0x108   :  { %v362_v14 = vpop.f32.mrf.mxu3  ;;  %1638 = vmatpush.bf16.msrb.mxu0 %v2833_v52  ;;  %v595_v38 = vmax.f32 %v326_v57, 0.0 }
 0x109   :  { %v363_v0 = vadd.f32 %v362_v14, %v3586_v59 }
 0x10a   :  { %v413_v6 = vpop.f32.mrf.mxu0  ;;  %v3618_v13 = vpop.f32.mrf.mxu2 }
 0x10b   :  { %v414_v31 = vadd.f32 %v413_v6, %v3565_v23  ;;  %v561_v10 = vmax.f32 %v363_v0, 0.0  ;;  %v2760_v6 = vld [vmem:[#allocation2 + $0x230] sm:$0xf] }
 0x10c   :  { %v3621_v3 = vpop.f32.mrf.mxu1 }
 0x10d   :  { %v569_v17 = vmax.f32 %v414_v31, 0.0 }
 0x10f   :  { %v3624_v53 = vpack.c.bf16 %v569_v17, %v562_v20  ;;  %v3069_v20 = vld [vmem:[#allocation2 + $0x234] sm:$0xf0]  ;;  %v275_v17 = vadd.f32 %v3477_v33, %v3466_v1  ;;  %v594_v33 = vmax.f32 %v277_v28, 0.0 }
 0x110   :  { %v364_v29 = vpop.f32.mrf.mxu3  ;;  %v2761_v44 = vor.u32 %v3069_v20, %v2760_v6  ;;  %v2824_v6 = vld [vmem:[#allocation2 + $0x2b0] sm:$0xf]  ;;  %v3085_v20 = vld [vmem:[#allocation2 + $0x2b4] sm:$0xf0] }
 0x111   :  { %v365_v56 = vadd.f32 %v364_v29, %v3586_v59 }
 0x112   :  { %v416_v63 = vpop.f32.mrf.mxu0  ;;  %v3631_v9 = vpop.f32.mrf.mxu2  ;;  %1590 = vmatpush.bf16.msrb.mxu3 %v2761_v44  ;;  %v2825_v44 = vor.u32 %v3085_v20, %v2824_v6  ;;  %v331_v6 = vadd.f32 %v3526_v32, %v3517_v2 }
 0x113   :  { %v568_v12 = vmax.f32 %v365_v56, 0.0  ;;  %v417_v31 = vadd.f32 %v416_v63, %v3565_v23  ;;  %v587_v63 = vmax.f32 %v275_v17, 0.0 }
 0x114   :  { %v3633_v34 = vpop.f32.mrf.mxu1  ;;  %1639 = vmatpush.bf16.msrb.mxu0 %v2825_v44 }
 0x115   :  { %1408 = vmatmul.bf16.gmra.mxu3 %v3472_v16  ;;  %1457 = vmatmul.bf16.gmra.mxu0 %v3627_v62  ;;  %v3637_v14 = vpack.c.bf16 %v568_v12, %v561_v10  ;;  %v576_v52 = vmax.f32 %v417_v31, 0.0  ;;  %v588_v12 = vmax.f32 %v324_v5, 0.0  ;;  %v3659_v31 = vpack.c.bf16 %v594_v33, %v587_v63 }
 0x117   :  { %4238 = vst [vmem:[#allocation24_spill] sm:$0xff] %v3637_v14  ;;  %1506 = vmatmul.bf16.gmra.mxu1 %v3629_v4  ;;  %1550 = vmatmul.bf16.gmra.mxu2 %v3637_v14  ;;  %v3661_v14 = vpack.c.bf16 %v595_v38, %v588_v12  ;;  %v282_v12 = vadd.f32 %v3520_v7, %v3466_v1  ;;  %v609_v7 = vmax.f32 %v331_v6, 0.0 }
 0x118   :  { %v367_v47 = vpop.f32.mrf.mxu3  ;;  %4239 = vst [vmem:[#allocation25_spill] sm:$0xff] %v3659_v31  ;;  %v329_v38 = vadd.f32 %v3514_v61, %v3517_v2 }
 0x119   :  { %v368_v55 = vadd.f32 %v367_v47, %v3586_v59  ;;  %4240 = vst [vmem:[#allocation26_spill] sm:$0xff] %v3661_v14 }
 0x11a   :  { %v418_v37 = vpop.f32.mrf.mxu0  ;;  %v3650_v0 = vpop.f32.mrf.mxu2 }
 0x11b   :  { %v419_v29 = vadd.f32 %v418_v37, %v3565_v23  ;;  %v575_v28 = vmax.f32 %v368_v55, 0.0 }
 0x11c   :  { %v3653_v56 = vpop.f32.mrf.mxu1 }
 0x11d   :  { %v583_v10 = vmax.f32 %v419_v29, 0.0  ;;  %v3067_v29 = vld [vmem:[#allocation2 + $0x224] sm:$0xf0] }
 0x11f   :  { %v3656_v4 = vpack.c.bf16 %v583_v10, %v576_v52  ;;  %v2752_v52 = vld [vmem:[#allocation2 + $0x220] sm:$0xf] }
 0x120   :  { %v369_v35 = vpop.f32.mrf.mxu3  ;;  %v2753_v33 = vor.u32 %v3067_v29, %v2752_v52  ;;  %v602_v52 = vmax.f32 %v329_v38, 0.0  ;;  %v2816_v29 = vld [vmem:[#allocation2 + $0x2a0] sm:$0xf] }
 0x121   :  { %v370_v62 = vadd.f32 %v369_v35, %v3586_v59 }
 0x122   :  { %v421_v37 = vpop.f32.mrf.mxu0  ;;  %v3663_v17 = vpop.f32.mrf.mxu2  ;;  %1591 = vmatpush.bf16.msrb.mxu3 %v2753_v33  ;;  %v3083_v33 = vld [vmem:[#allocation2 + $0x2a4] sm:$0xf0]  ;;  %v3693_v40 = vpack.c.bf16 %v609_v7, %v602_v52  ;;  %v2912_v7 = vld [vmem:[#allocation2 + $0x360] sm:$0xf] }
 0x123   :  { %v582_v5 = vmax.f32 %v370_v62, 0.0  ;;  %v422_v63 = vadd.f32 %v421_v37, %v3565_v23  ;;  %v280_v62 = vadd.f32 %v3501_v42, %v3466_v1  ;;  %v608_v42 = vmax.f32 %v282_v12, 0.0 }
 0x124   :  { %v3665_v57 = vpop.f32.mrf.mxu1  ;;  %4243 = vst [vmem:[#allocation29_spill] sm:$0xff] %v3693_v40 }
 0x125   :  { %1413 = vmatmul.bf16.gmra.mxu3 %v3496_v19  ;;  %1462 = vmatmul.bf16.gmra.mxu0 %v3659_v31  ;;  %v3669_v47 = vpack.c.bf16 %v582_v5, %v575_v28  ;;  %v590_v44 = vmax.f32 %v422_v63, 0.0  ;;  %v601_v28 = vmax.f32 %v280_v62, 0.0 }
 0x127   :  { %4241 = vst [vmem:[#allocation27_spill] sm:$0xff] %v3669_v47  ;;  %1511 = vmatmul.bf16.gmra.mxu1 %v3661_v14  ;;  %1555 = vmatmul.bf16.gmra.mxu2 %v3669_v47  ;;  %v2817_v14 = vor.u32 %v3083_v33, %v2816_v29  ;;  %v3691_v63 = vpack.c.bf16 %v608_v42, %v601_v28  ;;  %v3065_v42 = vld [vmem:[#allocation2 + $0x214] sm:$0xf0]  ;;  %v3107_v29 = vld [vmem:[#allocation2 + $0x364] sm:$0xf0] }
 0x128   :  { %v372_v10 = vpop.f32.mrf.mxu3  ;;  %v285_v33 = vadd.f32 %v3528_v43, %v3466_v1  ;;  %v2904_v43 = vld [vmem:[#allocation2 + $0x350] sm:$0xf] }
 0x129   :  { %v373_v61 = vadd.f32 %v372_v10, %v3586_v59  ;;  %4242 = vst [vmem:[#allocation28_spill] sm:$0xff] %v3691_v63  ;;  %1640 = vmatpush.bf16.msrb.mxu0 %v2817_v14  ;;  %v3109_v10 = vld [vmem:[#allocation2 + $0x374] sm:$0xf0]  ;;  %v2744_v14 = vld [vmem:[#allocation2 + $0x210] sm:$0xf] }
 0x12a   :  { %v423_v20 = vpop.f32.mrf.mxu0  ;;  %v3682_v55 = vpop.f32.mrf.mxu2 }
 0x12b   :  { %v424_v35 = vadd.f32 %v423_v20, %v3565_v23  ;;  %v589_v12 = vmax.f32 %v373_v61, 0.0  ;;  %v287_v61 = vadd.f32 %v3552_v8, %v3466_v1  ;;  %v615_v1 = vmax.f32 %v285_v33, 0.0 }
 0x12c   :  { %v3685_v37 = vpop.f32.mrf.mxu1 }
 0x12d   :  { %v597_v5 = vmax.f32 %v424_v35, 0.0  ;;  %v2920_v35 = vld [vmem:[#allocation2 + $0x370] sm:$0xf]  ;;  %v622_v8 = vmax.f32 %v287_v61, 0.0 }
 0x12e   :  { %v2921_v28 = vor.u32 %v3109_v10, %v2920_v35 }
 0x12f   :  { %v3688_v31 = vpack.c.bf16 %v597_v5, %v590_v44  ;;  %v3723_v58 = vpack.c.bf16 %v622_v8, %v615_v1 }
 0x130   :  { %v374_v32 = vpop.f32.mrf.mxu3  ;;  %1684 = vmatpush.bf16.msrb.mxu1 %v2921_v28 }
 0x131   :  { %v375_v47 = vadd.f32 %v374_v32, %v3586_v59  ;;  %v2913_v32 = vor.u32 %v3107_v29, %v2912_v7  ;;  %4245 = vst [vmem:[#allocation31_spill] sm:$0xff] %v3723_v58 }
 0x132   :  { %v426_v20 = vpop.f32.mrf.mxu0  ;;  %v3695_v62 = vpop.f32.mrf.mxu2 }
 0x133   :  { %v596_v38 = vmax.f32 %v375_v47, 0.0  ;;  %v427_v5 = vadd.f32 %v426_v20, %v3565_v23  ;;  %v2745_v47 = vor.u32 %v3065_v42, %v2744_v14  ;;  %v336_v20 = vadd.f32 %v3562_v36, %v3517_v2  ;;  %v3105_v42 = vld [vmem:[#allocation2 + $0x354] sm:$0xf0] }
 0x134   :  { %v3697_v6 = vpop.f32.mrf.mxu1  ;;  %1685 = vmatpush.bf16.msrb.mxu1 %v2913_v32  ;;  %v2905_v7 = vor.u32 %v3105_v42, %v2904_v43 }
 0x135   :  { %1418 = vmatmul.bf16.gmra.mxu3 %v3523_v15  ;;  %1467 = vmatmul.bf16.gmra.mxu0 %v3691_v63  ;;  %v3701_v44 = vpack.c.bf16 %v596_v38, %v589_v12  ;;  %v334_v12 = vadd.f32 %v3549_v27, %v3517_v2  ;;  %v604_v10 = vmax.f32 %v427_v5, 0.0  ;;  %v623_v27 = vmax.f32 %v336_v20, 0.0  ;;  %v3081_v63 = vld [vmem:[#allocation2 + $0x294] sm:$0xf0] }
 0x136   :  { %1592 = vmatpush.bf16.msrb.mxu3 %v2745_v47 }
 0x137   :  { %4244 = vst [vmem:[#allocation30_spill] sm:$0xff] %v3701_v44  ;;  %1516 = vmatmul.bf16.gmra.mxu1 %v3693_v40  ;;  %1560 = vmatmul.bf16.gmra.mxu2 %v3701_v44  ;;  %v616_v29 = vmax.f32 %v334_v12, 0.0  ;;  %v2808_v40 = vld [vmem:[#allocation2 + $0x290] sm:$0xf]  ;;  %v2896_v44 = vld [vmem:[#allocation2 + $0x340] sm:$0xf] }
 0x138   :  { %v377_v52 = vpop.f32.mrf.mxu3  ;;  %v2809_v36 = vor.u32 %v3081_v63, %v2808_v40  ;;  %1686 = vmatpush.bf16.msrb.mxu1 %v2905_v7  ;;  %v2897_v33 = vor.u32 %v3103_v30, %v2896_v44  ;;  %v2888_v63 = vld [vmem:[#allocation2 + $0x330] sm:$0xf]  ;;  %v2736_v30 = vld [vmem:[#allocation2 + $0x200] sm:$0xf]  ;;  %v3063_v44 = vld [vmem:[#allocation2 + $0x204] sm:$0xf0] }
 0x139   :  { %v378_v2 = vadd.f32 %v377_v52, %v3586_v59  ;;  %v3725_v12 = vpack.c.bf16 %v623_v27, %v616_v29  ;;  %v3101_v52 = vld [vmem:[#allocation2 + $0x334] sm:$0xf0]  ;;  %v2737_v8 = vor.u32 %v3063_v44, %v2736_v30  ;;  %v2538_v7 = vld [vmem:[#allocation2 + $0x78] sm:$0xf0] }
 0x13a   :  { %v428_v38 = vpop.f32.mrf.mxu0  ;;  %v3714_v35 = vpop.f32.mrf.mxu2  ;;  %1641 = vmatpush.bf16.msrb.mxu0 %v2809_v36  ;;  %v2889_v42 = vor.u32 %v3101_v52, %v2888_v63  ;;  %v3099_v36 = vld [vmem:[#allocation2 + $0x324] sm:$0xf0]  ;;  %v3097_v30 = vld [vmem:[#allocation2 + $0x314] sm:$0xf0] }
 0x13b   :  { %v429_v28 = vadd.f32 %v428_v38, %v3565_v23  ;;  %4246 = vst [vmem:[#allocation32_spill] sm:$0xff] %v3725_v12  ;;  %v603_v20 = vmax.f32 %v378_v2, 0.0  ;;  %v2880_v2 = vld [vmem:[#allocation2 + $0x320] sm:$0xf]  ;;  %1593 = vmatpush.bf16.msrb.mxu3 %v2737_v8 }
 0x13c   :  { %v3717_v14 = vpop.f32.mrf.mxu1  ;;  %1687 = vmatpush.bf16.msrb.mxu1 %v2897_v33  ;;  %v3010_v33 = vld [vmem:[#allocation2 + $0x64] sm:$0xf]  ;;  %v2800_v8 = vld [vmem:[#allocation2 + $0x280] sm:$0xf] }
 0x13d   :  { %v611_v47 = vmax.f32 %v429_v28, 0.0 }
 0x13f   :  { %v3720_v5 = vpack.c.bf16 %v611_v47, %v604_v10  ;;  %v3012_v47 = vld [vmem:[#allocation2 + $0x74] sm:$0xf] }
 0x140   :  { %v379_v38 = vpop.f32.mrf.mxu3  ;;  %1688 = vmatpush.bf16.msrb.mxu1 %v2889_v42  ;;  %v2541_v27 = vor.u32 %v3012_v47, %v2538_v7  ;;  %v2872_v42 = vld [vmem:[#allocation2 + $0x310] sm:$0xf]  ;;  %v3079_v7 = vld [vmem:[#allocation2 + $0x284] sm:$0xf0] }
 0x141   :  { %v380_v32 = vadd.f32 %v379_v38, %v3586_v59  ;;  %v2881_v38 = vor.u32 %v3099_v36, %v2880_v2  ;;  %v2801_v2 = vor.u32 %v3079_v7, %v2800_v8  ;;  %v2522_v36 = vld [vmem:[#allocation2 + $0x58] sm:$0xf0] }
 0x142   :  { %v431_v61 = vpop.f32.mrf.mxu0  ;;  %v3729_v40 = vpop.f32.mrf.mxu2  ;;  %1733 = vmatpush.bf16.msrb.mxu2 %v2541_v27 }
 0x143   :  { %v610_v28 = vmax.f32 %v380_v32, 0.0  ;;  %v432_v1 = vadd.f32 %v431_v61, %v3565_v23  ;;  %1642 = vmatpush.bf16.msrb.mxu0 %v2801_v2  ;;  %v3004_v2 = vld [vmem:[#allocation2 + $0x34] sm:$0xf] }
 0x144   :  { %v3727_v43 = vpop.f32.mrf.mxu1  ;;  %1689 = vmatpush.bf16.msrb.mxu1 %v2881_v38 }
 0x145   :  { %1423 = vmatmul.bf16.gmra.mxu3 %v3555_v25  ;;  %1472 = vmatmul.bf16.gmra.mxu0 %v3723_v58  ;;  %v3733_v10 = vpack.c.bf16 %v610_v28, %v603_v20  ;;  %v2530_v20 = vld [vmem:[#allocation2 + $0x68] sm:$0xf0]  ;;  %v618_v28 = vmax.f32 %v432_v1, 0.0  ;;  %v3008_v1 = vld [vmem:[#allocation2 + $0x54] sm:$0xf] }
 0x146   :  { %v2533_v52 = vor.u32 %v3010_v33, %v2530_v20  ;;  %v2525_v38 = vor.u32 %v3008_v1, %v2522_v36  ;;  %v2864_v33 = vld [vmem:[#allocation2 + $0x300] sm:$0xf]  ;;  %v3095_v20 = vld [vmem:[#allocation2 + $0x304] sm:$0xf0]  ;;  %v2506_v1 = vld [vmem:[#allocation2 + $0x38] sm:$0xf0] }
 0x147   :  { %4247 = vst [vmem:[#allocation33_spill] sm:$0xff] %v3733_v10  ;;  %1521 = vmatmul.bf16.gmra.mxu1 %v3725_v12  ;;  %1565 = vmatmul.bf16.gmra.mxu2 %v3733_v10  ;;  %v2873_v12 = vor.u32 %v3097_v30, %v2872_v42  ;;  %v2865_v42 = vor.u32 %v3095_v20, %v2864_v33  ;;  %v2514_v10 = vld [vmem:[#allocation2 + $0x48] sm:$0xf0] }
 0x148   :  { %v382_v29 = vpop.f32.mrf.mxu3  ;;  %1734 = vmatpush.bf16.msrb.mxu2 %v2533_v52  ;;  %v3006_v52 = vld [vmem:[#allocation2 + $0x44] sm:$0xf]  ;;  %v2498_v20 = vld [vmem:[#allocation2 + $0x28] sm:$0xf0] }
 0x149   :  { %v383_v27 = vadd.f32 %v382_v29, %v3586_v59  ;;  %1690 = vmatpush.bf16.msrb.mxu1 %v2873_v12  ;;  %v2517_v12 = vor.u32 %v3006_v52, %v2514_v10 }
 0x14a   :  { %v433_v32 = vpop.f32.mrf.mxu0  ;;  %v3741_v47 = vpop.f32.mrf.mxu2 }
 0x14b   :  { %v434_v63 = vadd.f32 %v433_v32, %v3565_v23  ;;  %v617_v60 = vmax.f32 %v383_v27, 0.0 }
 0x14c   :  { %v3739_v61 = vpop.f32.mrf.mxu1  ;;  %1735 = vmatpush.bf16.msrb.mxu2 %v2525_v38  ;;  %v2509_v38 = vor.u32 %v3004_v2, %v2506_v1 }
 0x14d   :  { %v625_v44 = vmax.f32 %v434_v63, 0.0  ;;  %1691 = vmatpush.bf16.msrb.mxu1 %v2865_v42 }
 0x14f   :  { %v3744_v32 = vpack.c.bf16 %v625_v44, %v618_v28  ;;  %v2602_v44 = vld [vmem:[#allocation2 + $0xf8] sm:$0xf0] }
 0x150   :  { %v384_v58 = vpop.f32.mrf.mxu3  ;;  %1736 = vmatpush.bf16.msrb.mxu2 %v2517_v12  ;;  %v2666_v12 = vld [vmem:[#allocation2 + $0x178] sm:$0xf0] }
 0x151   :  { %v385_v63 = vadd.f32 %v384_v58, %v3586_v59  ;;  %v3028_v58 = vld [vmem:[#allocation2 + $0xf4] sm:$0xf] }
 0x152   :  { %v436_v30 = vpop.f32.mrf.mxu0  ;;  %v2605_v27 = vor.u32 %v3028_v58, %v2602_v44  ;;  %v3756_v10 = vpop.f32.mrf.mxu2 }
 0x153   :  { %v624_v29 = vmax.f32 %v385_v63, 0.0  ;;  %v437_v7 = vadd.f32 %v436_v30, %v3565_v23 }
 0x154   :  { %v3747_v8 = vpop.f32.mrf.mxu1  ;;  %1782 = vmatpush.bf16.msra.mxu3 %v2605_v27  ;;  %1737 = vmatpush.bf16.msrb.mxu2 %v2509_v38 }
 0x155   :  { %1428 = vmatmul.bf16.gmra.mxu3 %v3432_v22  ;;  %1477 = vmatmul.bf16.gmra.mxu0 %v3483_v39  ;;  %v3751_v28 = vpack.c.bf16 %v624_v29, %v617_v60  ;;  %v3002_v60 = vld [vmem:[#allocation2 + $0x24] sm:$0xf]  ;;  %v632_v63 = vmax.f32 %v437_v7, 0.0  ;;  %v3044_v29 = vld [vmem:[#allocation2 + $0x174] sm:$0xf] }
 0x156   :  { %v2501_v30 = vor.u32 %v3002_v60, %v2498_v20  ;;  %v2669_v58 = vor.u32 %v3044_v29, %v2666_v12  ;;  %v2490_v39 = vld [vmem:[#allocation2 + $0x18] sm:$0xf0]  ;;  %v2998_v60 = vld [vmem:[#allocation2 + $0x4] sm:$0xf]  ;;  %v2482_v20 = vld [vmem:[#allocation2 + $0x8] sm:$0xf0] }
 0x157   :  { %4248 = vst [vmem:[#allocation34_spill] sm:$0xff] %v3751_v28  ;;  %1526 = vmatmul.bf16.gmra.mxu1 %v3534_v48  ;;  %1570 = vmatmul.bf16.gmra.mxu2 %v3751_v28  ;;  %v3000_v48 = vld [vmem:[#allocation2 + $0x14] sm:$0xf]  ;;  %v2485_v12 = vor.u32 %v2998_v60, %v2482_v20 }
 0x158   :  { %v387_v36 = vpop.f32.mrf.mxu3  ;;  %1738 = vmatpush.bf16.msrb.mxu2 %v2501_v30  ;;  %1831 = vmatpush.bf16.msra.mxu0 %v2669_v58  ;;  %v2493_v2 = vor.u32 %v3000_v48, %v2490_v39  ;;  %v3137_v39 = vld [vmem:[%s4190_s2] sm:$0xff] }
 0x159   :  { %v388_v27 = vadd.f32 %v387_v36, %v3586_v59  ;;  %v3772_v48 = vperm.slane %v3137_v39, 5  ;;  %v3026_v58 = vld [vmem:[#allocation2 + $0xe4] sm:$0xf] }
 0x15a   :  { %v438_v33 = vpop.f32.mrf.mxu0  ;;  %v3765_v28 = vpop.f32.mrf.mxu2 }
 0x15b   :  { %v439_v42 = vadd.f32 %v438_v33, %v3565_v23  ;;  %v631_v29 = vmax.f32 %v388_v27, 0.0  ;;  %v458_v60 = vadd.f32 %v3589_v21, %v3772_v48 }
 0x15c   :  { %v3759_v52 = vpop.f32.mrf.mxu1  ;;  %1739 = vmatpush.bf16.msrb.mxu2 %v2493_v2 }
 0x15d   :  { %v639_v44 = vmax.f32 %v439_v42, 0.0  ;;  %v556_v21 = vmax.f32 %v458_v60, 0.0 }
 0x15f   :  { %v3762_v1 = vpack.c.bf16 %v639_v44, %v632_v63  ;;  %v3778_v63 = vperm.slane %v3137_v39, 6  ;;  %v2594_v44 = vld [vmem:[#allocation2 + $0xe8] sm:$0xf0] }
 0x160   :  { %v389_v38 = vpop.f32.mrf.mxu3  ;;  %1740 = vmatpush.bf16.msrb.mxu2 %v2485_v12  ;;  %v2597_v2 = vor.u32 %v3026_v58, %v2594_v44  ;;  %v3042_v58 = vld [vmem:[#allocation2 + $0x164] sm:$0xf]  ;;  %v2658_v44 = vld [vmem:[#allocation2 + $0x168] sm:$0xf0] }
 0x161   :  { %v390_v7 = vadd.f32 %v389_v38, %v3586_v59  ;;  %v505_v20 = vadd.f32 %v3583_v18, %v3778_v63 }
 0x162   :  { %v441_v33 = vpop.f32.mrf.mxu0  ;;  %1783 = vmatpush.bf16.msra.mxu3 %v2597_v2 }
 0x163   :  { %v638_v42 = vmax.f32 %v390_v7, 0.0  ;;  %v442_v27 = vadd.f32 %v441_v33, %v3565_v23  ;;  %v456_v7 = vadd.f32 %v3567_v46, %v3772_v48  ;;  %v2661_v46 = vor.u32 %v3042_v58, %v2658_v44 }
 0x164   :  { %v3767_v30 = vpop.f32.mrf.mxu1  ;;  %v461_v58 = vadd.f32 %v3601_v54, %v3772_v48  ;;  %v463_v44 = vadd.f32 %v3621_v3, %v3772_v48 }
 0x165   :  { %1433 = vmatmul.bf16.gmra.mxu3 %v3456_v51  ;;  %1482 = vmatmul.bf16.gmra.mxu0 %v3507_v45  ;;  %v3776_v36 = vpack.c.bf16 %v638_v42, %v631_v29  ;;  %v507_v29 = vadd.f32 %v3599_v50, %v3778_v63  ;;  %v646_v12 = vmax.f32 %v442_v27, 0.0  ;;  %v549_v45 = vmax.f32 %v456_v7, 0.0  ;;  %v824_v7 = vld [vmem:[%s4192_s4] sm:$0x3] }
 0x166   :  { %1832 = vmatpush.bf16.msra.mxu0 %v2661_v46  ;;  %v570_v54 = vmax.f32 %v463_v44, 0.0  ;;  %v2578_v44 = vld [vmem:[#allocation2 + $0xc8] sm:$0xf0] }
 0x167   :  { %4249 = vst [vmem:[#allocation35_spill] sm:$0xff] %v3776_v36  ;;  %1531 = vmatmul.bf16.gmra.mxu1 %v3571_v49  ;;  %1575 = vmatmul.bf16.gmra.mxu2 %v3776_v36  ;;  %v3794_v49 = vpop.f32.mrf.mxu2  ;;  %v550_v36 = vmax.f32 %v505_v20, 0.0  ;;  %v557_v51 = vmax.f32 %v507_v29, 0.0  ;;  %v3799_v26 = vpack.c.bf16 %v556_v21, %v549_v45  ;;  %v3811_v45 = vperm.slane %v824_v7, 0  ;;  %v3040_v7 = vld [vmem:[#allocation2 + $0x154] sm:$0xf] }
 0x168   :  { %v392_v38 = vpop.f32.mrf.mxu3  ;;  %v510_v21 = vadd.f32 %v3618_v13, %v3778_v63 }
 0x169   :  { %v393_v18 = vadd.f32 %v392_v38, %v3586_v59  ;;  %4250 = vst [vmem:[#allocation36_spill] sm:$0xff] %v3799_v26 }
 0x16a   :  { %v443_v42 = vpop.f32.mrf.mxu0 }
 0x16b   :  { %v444_v33 = vadd.f32 %v443_v42, %v3565_v23  ;;  %v3802_v42 = vpack.c.bf16 %v557_v51, %v550_v36  ;;  %v645_v60 = vmax.f32 %v393_v18, 0.0  ;;  %v2586_v36 = vld [vmem:[#allocation2 + $0xd8] sm:$0xf0] }
 0x16c   :  { %v3792_v39 = vpop.f32.mrf.mxu1 }
 0x16d   :  { %v653_v2 = vmax.f32 %v444_v33, 0.0  ;;  %4251 = vst [vmem:[#allocation37_spill] sm:$0xff] %v3802_v42 }
 0x16f   :  { %v3797_v50 = vpack.c.bf16 %v653_v2, %v646_v12  ;;  %v3814_v51 = vpop.f32.mrf.mxu2  ;;  %v512_v2 = vadd.f32 %v3631_v9, %v3778_v63 }
 0x170   :  { %v394_v27 = vpop.f32.mrf.mxu3 }
 0x171   :  { %v395_v23 = vadd.f32 %v394_v27, %v3586_v59  ;;  %v3024_v59 = vld [vmem:[#allocation2 + $0xd4] sm:$0xf]  ;;  %v571_v3 = vmax.f32 %v512_v2, 0.0 }
 0x172   :  { %v1448_v22 = vpop.f32.mrf.mxu0  ;;  %v2589_v12 = vor.u32 %v3024_v59, %v2586_v36  ;;  %v563_v59 = vmax.f32 %v461_v58, 0.0  ;;  %v3022_v58 = vld [vmem:[#allocation2 + $0xc4] sm:$0xf] }
 0x173   :  { %v652_v20 = vmax.f32 %v395_v23, 0.0 }
 0x174   :  { %v1497_v29 = vpop.f32.mrf.mxu1  ;;  %1784 = vmatpush.bf16.msra.mxu3 %v2589_v12 }
 0x175   :  { %1594 = vmatmul.bf16.vlgmr.msrb.gmra.mxu3 %v3592_v24  ;;  %1643 = vmatmul.bf16.vlgmr.msrb.gmra.mxu0 %v3799_v26  ;;  %v3809_v38 = vpack.c.bf16 %v652_v20, %v645_v60  ;;  %v2650_v60 = vld [vmem:[#allocation2 + $0x158] sm:$0xf0]  ;;  %v3829_v26 = vpack.c.bf16 %v570_v54, %v563_v59 }
 0x176   :  { %v2653_v20 = vor.u32 %v3040_v7, %v2650_v60  ;;  %v517_v7 = vadd.f32 %v3663_v17, %v3778_v63 }
 0x177   :  { %4252 = vst [vmem:[#allocation38_spill] sm:$0xff] %v3809_v38  ;;  %1692 = vmatmul.bf16.vlgmr.msrb.gmra.mxu1 %v3802_v42  ;;  %1580 = vmatmul.bf16.gmra.mxu2 %v3809_v38  ;;  %v564_v42 = vmax.f32 %v510_v21, 0.0  ;;  %v3826_v12 = vpop.f32.mrf.mxu2  ;;  %v2581_v21 = vor.u32 %v3022_v58, %v2578_v44 }
 0x178   :  { %v1399_v33 = vpop.f32.mrf.mxu3  ;;  %1833 = vmatpush.bf16.msra.mxu0 %v2653_v20  ;;  %v585_v44 = vmax.f32 %v517_v7, 0.0 }
 0x179   :  { %v1400_v46 = vadd.f32 %v1399_v33, %v3811_v45  ;;  %v3831_v38 = vpack.c.bf16 %v571_v3, %v564_v42  ;;  %v468_v42 = vadd.f32 %v3653_v56, %v3772_v48  ;;  %1785 = vmatpush.bf16.msra.mxu3 %v2581_v21  ;;  %v3038_v3 = vld [vmem:[#allocation2 + $0x144] sm:$0xf] }
 0x17a   :  { %v1450_v18 = vpop.f32.mrf.mxu0 }
 0x17b   :  { %v1449_v27 = vadd.f32 %v1448_v22, %v1400_v46  ;;  %4253 = vst [vmem:[#allocation39_spill] sm:$0xff] %v3831_v38  ;;  %v584_v56 = vmax.f32 %v468_v42, 0.0  ;;  %v2570_v42 = vld [vmem:[#allocation2 + $0xb8] sm:$0xf0] }
 0x17c   :  { %v1499_v23 = vpop.f32.mrf.mxu1 }
 0x17d   :  { %v1498_v36 = vadd.f32 %v1497_v29, %v1449_v27  ;;  %v466_v27 = vadd.f32 %v3633_v34, %v3772_v48  ;;  %v2642_v34 = vld [vmem:[#allocation2 + $0x148] sm:$0xf0] }
 0x180   :  { %v1401_v33 = vpop.f32.mrf.mxu3 }
 0x181   :  { %v1402_v13 = vadd.f32 %v1401_v33, %v3811_v45  ;;  %v2645_v33 = vor.u32 %v3038_v3, %v2642_v34 }
 0x182   :  { %v1453_v9 = vpop.f32.mrf.mxu0 }
 0x183   :  { %v1451_v22 = vadd.f32 %v1450_v18, %v1402_v13  ;;  %v577_v13 = vmax.f32 %v466_v27, 0.0  ;;  %1834 = vmatpush.bf16.msra.mxu0 %v2645_v33  ;;  %v3020_v27 = vld [vmem:[#allocation2 + $0xb4] sm:$0xf] }
 0x184   :  { %v1502_v46 = vpop.f32.mrf.mxu1 }
 0x185   :  { %1599 = vmatmul.bf16.gmra.mxu3 %v3624_v53  ;;  %1648 = vmatmul.bf16.gmra.mxu0 %v3829_v26  ;;  %v1500_v29 = vadd.f32 %v1499_v23, %v1451_v22  ;;  %v515_v23 = vadd.f32 %v3650_v0, %v3778_v63 }
 0x187   :  { %1697 = vmatmul.bf16.gmra.mxu1 %v3831_v38  ;;  %1741 = vmatmul.bf16.vlgmr.msrb.gmra.mxu2 %v3421_v11  ;;  %v578_v58 = vmax.f32 %v515_v23, 0.0  ;;  %v2573_v23 = vor.u32 %v3020_v27, %v2570_v42 }
 0x188   :  { %v1404_v2 = vpop.f32.mrf.mxu3 }
 0x189   :  { %v1405_v18 = vadd.f32 %v1404_v2, %v3811_v45  ;;  %v3849_v2 = vpack.c.bf16 %v584_v56, %v577_v13  ;;  %1786 = vmatpush.bf16.msra.mxu3 %v2573_v23  ;;  %v3036_v56 = vld [vmem:[#allocation2 + $0x134] sm:$0xf] }
 0x18a   :  { %v1455_v60 = vpop.f32.mrf.mxu0  ;;  %v1546_v20 = vpop.f32.mrf.mxu2 }
 0x18b   :  { %v1454_v11 = vadd.f32 %v1453_v9, %v1405_v18  ;;  %v3846_v54 = vadd.f32 %v1546_v20, %v1498_v36  ;;  %v3851_v9 = vpack.c.bf16 %v585_v44, %v578_v58 }
 0x18c   :  { %v1504_v59 = vpop.f32.mrf.mxu1 }
 0x18d   :  { %v1503_v22 = vadd.f32 %v1502_v46, %v1454_v11  ;;  %v471_v11 = vadd.f32 %v3665_v57, %v3772_v48  ;;  %v2634_v57 = vld [vmem:[#allocation2 + $0x138] sm:$0xf0] }
 0x18e   :  { %v2637_v58 = vor.u32 %v3036_v56, %v2634_v57 }
 0x18f   :  { %v591_v44 = vmax.f32 %v471_v11, 0.0  ;;  %v3018_v11 = vld [vmem:[#allocation2 + $0xa4] sm:$0xf] }
 0x190   :  { %v1406_v21 = vpop.f32.mrf.mxu3  ;;  %1835 = vmatpush.bf16.msra.mxu0 %v2637_v58 }
 0x191   :  { %v1407_v0 = vadd.f32 %v1406_v21, %v3811_v45 }
 0x192   :  { %v1458_v17 = vpop.f32.mrf.mxu0  ;;  %v1548_v38 = vpop.f32.mrf.mxu2 }
 0x193   :  { %v1456_v36 = vadd.f32 %v1455_v60, %v1407_v0  ;;  %v3853_v20 = vadd.f32 %v1548_v38, %v1500_v29  ;;  %v473_v38 = vadd.f32 %v3685_v37, %v3772_v48  ;;  %v520_v60 = vadd.f32 %v3682_v55, %v3778_v63 }
 0x194   :  { %v1507_v18 = vpop.f32.mrf.mxu1 }
 0x195   :  { %1604 = vmatmul.bf16.gmra.mxu3 %v3656_v4  ;;  %1653 = vmatmul.bf16.gmra.mxu0 %v3849_v2  ;;  %v1505_v46 = vadd.f32 %v1504_v59, %v1456_v36  ;;  %v522_v59 = vadd.f32 %v3695_v62, %v3778_v63  ;;  %v598_v37 = vmax.f32 %v473_v38, 0.0  ;;  %v592_v0 = vmax.f32 %v520_v60, 0.0  ;;  %v2562_v38 = vld [vmem:[#allocation2 + $0xa8] sm:$0xf0] }
 0x196   :  { %v2565_v60 = vor.u32 %v3018_v11, %v2562_v38 }
 0x197   :  { %1702 = vmatmul.bf16.gmra.mxu1 %v3851_v9  ;;  %1746 = vmatmul.bf16.gmra.mxu2 %v3445_v41  ;;  %v599_v36 = vmax.f32 %v522_v59, 0.0  ;;  %v3871_v42 = vpack.c.bf16 %v598_v37, %v591_v44  ;;  %v3034_v37 = vld [vmem:[#allocation2 + $0x124] sm:$0xf] }
 0x198   :  { %v1409_v7 = vpop.f32.mrf.mxu3  ;;  %1787 = vmatpush.bf16.msra.mxu3 %v2565_v60 }
 0x199   :  { %v1410_v29 = vadd.f32 %v1409_v7, %v3811_v45 }
 0x19a   :  { %v1460_v3 = vpop.f32.mrf.mxu0  ;;  %v1551_v34 = vpop.f32.mrf.mxu2 }
 0x19b   :  { %v1459_v41 = vadd.f32 %v1458_v17, %v1410_v29  ;;  %v3868_v13 = vadd.f32 %v1551_v34, %v1503_v22  ;;  %v3873_v17 = vpack.c.bf16 %v599_v36, %v592_v0  ;;  %v476_v34 = vadd.f32 %v3697_v6, %v3772_v48  ;;  %v2626_v6 = vld [vmem:[#allocation2 + $0x128] sm:$0xf0] }
 0x19c   :  { %v1509_v33 = vpop.f32.mrf.mxu1  ;;  %v2629_v0 = vor.u32 %v3034_v37, %v2626_v6  ;;  %v481_v37 = vadd.f32 %v3727_v43, %v3772_v48  ;;  %v483_v6 = vadd.f32 %v3739_v61, %v3772_v48  ;;  %v3032_v43 = vld [vmem:[#allocation2 + $0x114] sm:$0xf] }
 0x19d   :  { %v1508_v21 = vadd.f32 %v1507_v18, %v1459_v41  ;;  %v525_v41 = vadd.f32 %v3714_v35, %v3778_v63  ;;  %v605_v36 = vmax.f32 %v476_v34, 0.0  ;;  %v2730_v34 = vld [vmem:[#allocation2 + $0x1f8] sm:$0xf0]  ;;  %v3056_v61 = vld [vmem:[#allocation2 + $0x1d4] sm:$0xf] }
 0x19e   :  { %1836 = vmatpush.bf16.msra.mxu0 %v2629_v0 }
 0x1a0   :  { %v1411_v27 = vpop.f32.mrf.mxu3 }
 0x1a1   :  { %v1412_v55 = vadd.f32 %v1411_v27, %v3811_v45 }
 0x1a2   :  { %v1463_v62 = vpop.f32.mrf.mxu0  ;;  %v1553_v23 = vpop.f32.mrf.mxu2 }
 0x1a3   :  { %v1461_v22 = vadd.f32 %v1460_v3, %v1412_v55  ;;  %v3875_v29 = vadd.f32 %v1553_v23, %v1505_v46  ;;  %v478_v46 = vadd.f32 %v3717_v14, %v3772_v48  ;;  %v606_v55 = vmax.f32 %v525_v41, 0.0  ;;  %v3016_v41 = vld [vmem:[#allocation2 + $0x94] sm:$0xf] }
 0x1a4   :  { %v1512_v7 = vpop.f32.mrf.mxu1 }
 0x1a5   :  { %1609 = vmatmul.bf16.gmra.mxu3 %v3688_v31  ;;  %1658 = vmatmul.bf16.gmra.mxu0 %v3871_v42  ;;  %v1510_v18 = vadd.f32 %v1509_v33, %v1461_v22  ;;  %v527_v33 = vadd.f32 %v3729_v40, %v3778_v63  ;;  %v612_v14 = vmax.f32 %v478_v46, 0.0 }
 0x1a7   :  { %1707 = vmatmul.bf16.gmra.mxu1 %v3873_v17  ;;  %1751 = vmatmul.bf16.gmra.mxu2 %v3472_v16  ;;  %v613_v23 = vmax.f32 %v527_v33, 0.0  ;;  %v3893_v11 = vpack.c.bf16 %v612_v14, %v605_v36  ;;  %v2554_v33 = vld [vmem:[#allocation2 + $0x98] sm:$0xf0]  ;;  %v530_v36 = vadd.f32 %v3741_v47, %v3778_v63 }
 0x1a8   :  { %v1414_v59 = vpop.f32.mrf.mxu3 }
 0x1a9   :  { %v1415_v3 = vadd.f32 %v1414_v59, %v3811_v45  ;;  %v620_v47 = vmax.f32 %v530_v36, 0.0  ;;  %v3052_v36 = vld [vmem:[#allocation2 + $0x1b4] sm:$0xf] }
 0x1aa   :  { %v1465_v56 = vpop.f32.mrf.mxu0  ;;  %v1556_v57 = vpop.f32.mrf.mxu2 }
 0x1ab   :  { %v1464_v16 = vadd.f32 %v1463_v62, %v1415_v3  ;;  %v3890_v44 = vadd.f32 %v1556_v57, %v1508_v21  ;;  %v3895_v62 = vpack.c.bf16 %v613_v23, %v606_v55  ;;  %v3060_v3 = vld [vmem:[#allocation2 + $0x1f4] sm:$0xf]  ;;  %v2557_v57 = vor.u32 %v3016_v41, %v2554_v33 }
 0x1ac   :  { %v1514_v58 = vpop.f32.mrf.mxu1  ;;  %v2733_v46 = vor.u32 %v3060_v3, %v2730_v34  ;;  %v2714_v3 = vld [vmem:[#allocation2 + $0x1d8] sm:$0xf0]  ;;  %v619_v34 = vmax.f32 %v481_v37, 0.0 }
 0x1ad   :  { %v1513_v27 = vadd.f32 %v1512_v7, %v1464_v16  ;;  %v3058_v16 = vld [vmem:[#allocation2 + $0x1e4] sm:$0xf]  ;;  %1788 = vmatpush.bf16.msra.mxu3 %v2557_v57  ;;  %v2717_v33 = vor.u32 %v3056_v61, %v2714_v3  ;;  %v2546_v61 = vld [vmem:[#allocation2 + $0x88] sm:$0xf0] }
 0x1ae   :  { %1880 = vmatpush.bf16.msra.mxu1 %v2733_v46  ;;  %v626_v46 = vmax.f32 %v483_v6, 0.0 }
 0x1b0   :  { %v1416_v22 = vpop.f32.mrf.mxu3 }
 0x1b1   :  { %v1417_v35 = vadd.f32 %v1416_v22, %v3811_v45 }
 0x1b2   :  { %v1468_v40 = vpop.f32.mrf.mxu0  ;;  %v1558_v38 = vpop.f32.mrf.mxu2 }
 0x1b3   :  { %v1466_v21 = vadd.f32 %v1465_v56, %v1417_v35  ;;  %v3897_v59 = vadd.f32 %v1558_v38, %v1510_v18  ;;  %v2722_v18 = vld [vmem:[#allocation2 + $0x1e8] sm:$0xf0]  ;;  %v2618_v38 = vld [vmem:[#allocation2 + $0x118] sm:$0xf0] }
 0x1b4   :  { %v1517_v60 = vpop.f32.mrf.mxu1  ;;  %v2725_v0 = vor.u32 %v3058_v16, %v2722_v18  ;;  %v3915_v16 = vpack.c.bf16 %v626_v46, %v619_v34  ;;  %v3050_v46 = vld [vmem:[#allocation2 + $0x1a4] sm:$0xf] }
 0x1b5   :  { %1614 = vmatmul.bf16.gmra.mxu3 %v3720_v5  ;;  %1663 = vmatmul.bf16.gmra.mxu0 %v3893_v11  ;;  %v1515_v7 = vadd.f32 %v1514_v58, %v1466_v21  ;;  %v2621_v21 = vor.u32 %v3032_v43, %v2618_v38  ;;  %v3014_v38 = vld [vmem:[#allocation2 + $0x84] sm:$0xf] }
 0x1b6   :  { %1881 = vmatpush.bf16.msra.mxu1 %v2725_v0 }
 0x1b7   :  { %1712 = vmatmul.bf16.gmra.mxu1 %v3895_v62  ;;  %1756 = vmatmul.bf16.gmra.mxu2 %v3496_v19  ;;  %v532_v19 = vadd.f32 %v3756_v10, %v3778_v63 }
 0x1b8   :  { %v1419_v56 = vpop.f32.mrf.mxu3  ;;  %1837 = vmatpush.bf16.msra.mxu0 %v2621_v21  ;;  %v3076_v21 = vld [vmem:[#allocation2 + $0x274] sm:$0xf] }
 0x1b9   :  { %v1420_v58 = vadd.f32 %v1419_v56, %v3811_v45  ;;  %v627_v57 = vmax.f32 %v532_v19, 0.0  ;;  %v3054_v56 = vld [vmem:[#allocation2 + $0x1c4] sm:$0xf]  ;;  %v2698_v19 = vld [vmem:[#allocation2 + $0x1b8] sm:$0xf0] }
 0x1ba   :  { %v1470_v14 = vpop.f32.mrf.mxu0  ;;  %v1561_v55 = vpop.f32.mrf.mxu2  ;;  %1882 = vmatpush.bf16.msra.mxu1 %v2717_v33  ;;  %v2701_v43 = vor.u32 %v3052_v36, %v2698_v19  ;;  %v2690_v33 = vld [vmem:[#allocation2 + $0x1a8] sm:$0xf0]  ;;  %v3030_v19 = vld [vmem:[#allocation2 + $0x104] sm:$0xf] }
 0x1bb   :  { %v1469_v23 = vadd.f32 %v1468_v40, %v1420_v58  ;;  %v3912_v35 = vadd.f32 %v1561_v55, %v1513_v27  ;;  %v2706_v40 = vld [vmem:[#allocation2 + $0x1c8] sm:$0xf0]  ;;  %v3917_v55 = vpack.c.bf16 %v627_v57, %v620_v47  ;;  %v486_v47 = vadd.f32 %v3747_v8, %v3772_v48 }
 0x1bc   :  { %v1519_v22 = vpop.f32.mrf.mxu1  ;;  %v2709_v18 = vor.u32 %v3054_v56, %v2706_v40  ;;  %v537_v56 = vadd.f32 %v3794_v49, %v3778_v63 }
 0x1bd   :  { %v1518_v41 = vadd.f32 %v1517_v60, %v1469_v23 }
 0x1be   :  { %1883 = vmatpush.bf16.msra.mxu1 %v2709_v18  ;;  %v3074_v18 = vld [vmem:[#allocation2 + $0x264] sm:$0xf] }
 0x1c0   :  { %v1421_v10 = vpop.f32.mrf.mxu3 }
 0x1c1   :  { %v1422_v27 = vadd.f32 %v1421_v10, %v3811_v45  ;;  %v2693_v10 = vor.u32 %v3050_v46, %v2690_v33  ;;  %v641_v46 = vmax.f32 %v537_v56, 0.0  ;;  %v2770_v56 = vld [vmem:[#allocation2 + $0x248] sm:$0xf0] }
 0x1c2   :  { %v1473_v58 = vpop.f32.mrf.mxu0  ;;  %v1563_v0 = vpop.f32.mrf.mxu2  ;;  %1884 = vmatpush.bf16.msra.mxu1 %v2701_v43  ;;  %v2610_v43 = vld [vmem:[#allocation2 + $0x108] sm:$0xf0] }
 0x1c3   :  { %v1471_v37 = vadd.f32 %v1470_v14, %v1422_v27  ;;  %v3919_v60 = vadd.f32 %v1563_v0, %v1515_v7  ;;  %v2549_v14 = vor.u32 %v3014_v38, %v2546_v61  ;;  %v2794_v7 = vld [vmem:[#allocation2 + $0x278] sm:$0xf0]  ;;  %v2786_v0 = vld [vmem:[#allocation2 + $0x268] sm:$0xf0]  ;;  %v3048_v38 = vld [vmem:[#allocation2 + $0x194] sm:$0xf]  ;;  %v2613_v61 = vor.u32 %v3030_v19, %v2610_v43 }
 0x1c4   :  { %v1522_v6 = vpop.f32.mrf.mxu1  ;;  %v2797_v34 = vor.u32 %v3076_v21, %v2794_v7  ;;  %v2682_v21 = vld [vmem:[#allocation2 + $0x198] sm:$0xf0] }
 0x1c5   :  { %1619 = vmatmul.bf16.gmra.mxu3 %v3744_v32  ;;  %1668 = vmatmul.bf16.gmra.mxu0 %v3915_v16  ;;  %v1520_v23 = vadd.f32 %v1519_v22, %v1471_v37  ;;  %v488_v22 = vadd.f32 %v3759_v52, %v3772_v48  ;;  %v2789_v52 = vor.u32 %v3074_v18, %v2786_v0 }
 0x1c6   :  { %1789 = vmatpush.bf16.msra.mxu3 %v2549_v14  ;;  %1929 = vmatpush.bf16.msra.mxu2 %v2797_v34  ;;  %v2685_v49 = vor.u32 %v3048_v38, %v2682_v21  ;;  %v3072_v34 = vld [vmem:[#allocation2 + $0x254] sm:$0xf]  ;;  %v2858_v21 = vld [vmem:[#allocation2 + $0x2f8] sm:$0xf0] }
 0x1c7   :  { %1717 = vmatmul.bf16.gmra.mxu1 %v3917_v55  ;;  %1761 = vmatmul.bf16.gmra.mxu2 %v3523_v15  ;;  %v535_v15 = vadd.f32 %v3765_v28, %v3778_v63  ;;  %v633_v28 = vmax.f32 %v486_v47, 0.0  ;;  %v640_v14 = vmax.f32 %v488_v22, 0.0 }
 0x1c8   :  { %v1424_v3 = vpop.f32.mrf.mxu3  ;;  %1885 = vmatpush.bf16.msra.mxu1 %v2693_v10  ;;  %1838 = vmatpush.bf16.msra.mxu0 %v2613_v61  ;;  %v2674_v10 = vld [vmem:[#allocation2 + $0x188] sm:$0xf0]  ;;  %v3092_v61 = vld [vmem:[#allocation2 + $0x2f4] sm:$0xf] }
 0x1c9   :  { %v1425_v57 = vadd.f32 %v1424_v3, %v3811_v45  ;;  %v634_v3 = vmax.f32 %v535_v15, 0.0  ;;  %v3937_v18 = vpack.c.bf16 %v640_v14, %v633_v28  ;;  %v3070_v15 = vld [vmem:[#allocation2 + $0x244] sm:$0xf]  ;;  %v3068_v28 = vld [vmem:[#allocation2 + $0x234] sm:$0xf]  ;;  %v2861_v14 = vor.u32 %v3092_v61, %v2858_v21 }
 0x1ca   :  { %v1475_v40 = vpop.f32.mrf.mxu0  ;;  %v1566_v27 = vpop.f32.mrf.mxu2  ;;  %1930 = vmatpush.bf16.msra.mxu2 %v2789_v52  ;;  %v2773_v43 = vor.u32 %v3070_v15, %v2770_v56 }
 0x1cb   :  { %v1474_v37 = vadd.f32 %v1473_v58, %v1425_v57  ;;  %v3934_v36 = vadd.f32 %v1566_v27, %v1518_v41  ;;  %v2778_v58 = vld [vmem:[#allocation2 + $0x258] sm:$0xf0]  ;;  %v3046_v57 = vld [vmem:[#allocation2 + $0x184] sm:$0xf]  ;;  %1978 = vmatpush.bf16.msrb.mxu3 %v2861_v14 }
 0x1cc   :  { %v1524_v8 = vpop.f32.mrf.mxu1  ;;  %1886 = vmatpush.bf16.msra.mxu1 %v2685_v49  ;;  %v2781_v41 = vor.u32 %v3072_v34, %v2778_v58  ;;  %v2677_v0 = vor.u32 %v3046_v57, %v2674_v10  ;;  %v540_v34 = vadd.f32 %v3814_v51, %v3778_v63  ;;  %v542_v58 = vadd.f32 %v3826_v12, %v3778_v63  ;;  %v2754_v57 = vld [vmem:[#allocation2 + $0x228] sm:$0xf0]  ;;  %v3064_v51 = vld [vmem:[#allocation2 + $0x214] sm:$0xf]  ;;  %v2922_v63 = vld [vmem:[#allocation2 + $0x378] sm:$0xf0] }
 0x1cd   :  { %v1523_v7 = vadd.f32 %v1522_v6, %v1474_v37  ;;  %v3939_v6 = vpack.c.bf16 %v641_v46, %v634_v3  ;;  %v491_v3 = vadd.f32 %v3767_v30, %v3772_v48  ;;  %v493_v46 = vadd.f32 %v3792_v39, %v3772_v48 }
 0x1ce   :  { %1931 = vmatpush.bf16.msra.mxu2 %v2781_v41  ;;  %v648_v15 = vmax.f32 %v540_v34, 0.0  ;;  %v655_v56 = vmax.f32 %v542_v58, 0.0  ;;  %v4254_v58 = vld [vmem:[#allocation11_spill] sm:$0xff] }
 0x1cf   :  { %v647_v48 = vmax.f32 %v491_v3, 0.0  ;;  %v654_v39 = vmax.f32 %v493_v46, 0.0 }
 0x1d0   :  { %v1426_v33 = vpop.f32.mrf.mxu3  ;;  %1887 = vmatpush.bf16.msra.mxu1 %v2677_v0 }
 0x1d1   :  { %v1427_v27 = vadd.f32 %v1426_v33, %v3811_v45  ;;  %v3066_v33 = vld [vmem:[#allocation2 + $0x224] sm:$0xf] }
 0x1d2   :  { %v1478_v47 = vpop.f32.mrf.mxu0  ;;  %v1568_v22 = vpop.f32.mrf.mxu2  ;;  %1932 = vmatpush.bf16.msra.mxu2 %v2773_v43  ;;  %v2757_v0 = vor.u32 %v3066_v33, %v2754_v57  ;;  %v3108_v43 = vld [vmem:[#allocation2 + $0x374] sm:$0xf]  ;;  %v3090_v57 = vld [vmem:[#allocation2 + $0x2e4] sm:$0xf] }
 0x1d3   :  { %v1476_v37 = vadd.f32 %v1475_v40, %v1427_v27  ;;  %v3941_v19 = vadd.f32 %v1568_v22, %v1520_v23  ;;  %v2762_v40 = vld [vmem:[#allocation2 + $0x238] sm:$0xf0]  ;;  %v2925_v21 = vor.u32 %v3108_v43, %v2922_v63 }
 0x1d4   :  { %v1527_v52 = vpop.f32.mrf.mxu1  ;;  %v2765_v23 = vor.u32 %v3068_v28, %v2762_v40  ;;  %v3961_v40 = vpack.c.bf16 %v655_v56, %v648_v15 }
 0x1d5   :  { %1624 = vmatmul.bf16.gmra.mxu3 %v3762_v1  ;;  %1673 = vmatmul.bf16.gmra.mxu0 %v3937_v18  ;;  %v1525_v38 = vadd.f32 %v1524_v8, %v1476_v37  ;;  %v2746_v37 = vld [vmem:[#allocation2 + $0x218] sm:$0xf0] }
 0x1d6   :  { %1933 = vmatpush.bf16.msra.mxu2 %v2765_v23  ;;  %v2749_v12 = vor.u32 %v3064_v51, %v2746_v37  ;;  %2027 = vmatpush.bf16.msrb.mxu0 %v2925_v21  ;;  %v2914_v51 = vld [vmem:[#allocation2 + $0x368] sm:$0xf0] }
 0x1d7   :  { %1722 = vmatmul.bf16.gmra.mxu1 %v3939_v6  ;;  %1766 = vmatmul.bf16.gmra.mxu2 %v3555_v25 }
 0x1d8   :  { %v1429_v49 = vpop.f32.mrf.mxu3 }
 0x1d9   :  { %v1430_v8 = vadd.f32 %v1429_v49, %v3811_v45  ;;  %v2738_v49 = vld [vmem:[#allocation2 + $0x208] sm:$0xf0] }
 0x1da   :  { %v1480_v25 = vpop.f32.mrf.mxu0  ;;  %v1571_v41 = vpop.f32.mrf.mxu2  ;;  %1934 = vmatpush.bf16.msra.mxu2 %v2757_v0 }
 0x1db   :  { %v1479_v10 = vadd.f32 %v1478_v47, %v1430_v8  ;;  %v3956_v30 = vadd.f32 %v1571_v41, %v1523_v7  ;;  %v3959_v47 = vpack.c.bf16 %v654_v39, %v647_v48 }
 0x1dc   :  { %v1529_v27 = vpop.f32.mrf.mxu1 }
 0x1dd   :  { %v1528_v22 = vadd.f32 %v1527_v52, %v1479_v10  ;;  %v3062_v52 = vld [vmem:[#allocation2 + $0x204] sm:$0xf]  ;;  %v2850_v10 = vld [vmem:[#allocation2 + $0x2e8] sm:$0xf0] }
 0x1de   :  { %1935 = vmatpush.bf16.msra.mxu2 %v2749_v12  ;;  %v2741_v8 = vor.u32 %v3062_v52, %v2738_v49  ;;  %v4255_v52 = vld [vmem:[#allocation16_spill] sm:$0xff]  ;;  %v4257_v49 = vld [vmem:[#allocation21_spill] sm:$0xff] }
 0x1e0   :  { %v1431_v61 = vpop.f32.mrf.mxu3 }
 0x1e1   :  { %v1432_v28 = vadd.f32 %v1431_v61, %v3811_v45 }
 0x1e2   :  { %v1483_v7 = vpop.f32.mrf.mxu0  ;;  %v1573_v14 = vpop.f32.mrf.mxu2  ;;  %1936 = vmatpush.bf16.msra.mxu2 %v2741_v8  ;;  %v4258_v8 = vld [vmem:[#allocation12_spill] sm:$0xff] }
 0x1e3   :  { %v1481_v23 = vadd.f32 %v1480_v25, %v1432_v28  ;;  %v3963_v46 = vadd.f32 %v1573_v14, %v1525_v38  ;;  %v2853_v38 = vor.u32 %v3090_v57, %v2850_v10 }
 0x1e4   :  { %v1532_v3 = vpop.f32.mrf.mxu1 }
 0x1e5   :  { %1629 = vmatmul.bf16.gmra.mxu3 %v3797_v50  ;;  %1678 = vmatmul.bf16.gmra.mxu0 %v3959_v47  ;;  %v1530_v34 = vadd.f32 %v1529_v27, %v1481_v23  ;;  %v3106_v27 = vld [vmem:[#allocation2 + $0x364] sm:$0xf]  ;;  %v3088_v23 = vld [vmem:[#allocation2 + $0x2d4] sm:$0xf] }
 0x1e6   :  { %1979 = vmatpush.bf16.msrb.mxu3 %v2853_v38  ;;  %v2917_v43 = vor.u32 %v3106_v27, %v2914_v51  ;;  %v3104_v38 = vld [vmem:[#allocation2 + $0x354] sm:$0xf] }
 0x1e7   :  { %1727 = vmatmul.bf16.gmra.mxu1 %v3961_v40  ;;  %1771 = vmatmul.bf16.gmra.mxu2 %v4254_v58 }
 0x1e8   :  { %v1434_v41 = vpop.f32.mrf.mxu3  ;;  %2028 = vmatpush.bf16.msrb.mxu0 %v2917_v43 }
 0x1e9   :  { %v1435_v33 = vadd.f32 %v1434_v41, %v3811_v45 }
 0x1ea   :  { %v1485_v25 = vpop.f32.mrf.mxu0  ;;  %v1576_v0 = vpop.f32.mrf.mxu2 }
 0x1eb   :  { %v1484_v48 = vadd.f32 %v1483_v7, %v1435_v33  ;;  %v3970_v15 = vadd.f32 %v1576_v0, %v1528_v22  ;;  %v4256_v7 = vld [vmem:[#allocation17_spill] sm:$0xff] }
 0x1ec   :  { %v1534_v39 = vpop.f32.mrf.mxu1 }
 0x1ed   :  { %v1533_v56 = vadd.f32 %v1532_v3, %v1484_v48  ;;  %v2842_v3 = vld [vmem:[#allocation2 + $0x2d8] sm:$0xf0] }
 0x1ee   :  { %v2845_v58 = vor.u32 %v3088_v23, %v2842_v3  ;;  %v2906_v48 = vld [vmem:[#allocation2 + $0x358] sm:$0xf0] }
 0x1ef   :  { %v2909_v27 = vor.u32 %v3104_v38, %v2906_v48 }
 0x1f0   :  { %v1436_v37 = vpop.f32.mrf.mxu3  ;;  %1980 = vmatpush.bf16.msrb.mxu3 %v2845_v58 }
 0x1f1   :  { %v1437_v63 = vadd.f32 %v1436_v37, %v3811_v45  ;;  %2029 = vmatpush.bf16.msrb.mxu0 %v2909_v27 }
 0x1f2   :  { %v1578_v12 = vpop.f32.mrf.mxu2  ;;  %v1644_v61 = vpop.f32.mrf.mxu0 }
 0x1f3   :  { %v1486_v21 = vadd.f32 %v1485_v25, %v1437_v63  ;;  %v3973_v28 = vadd.f32 %v1578_v12, %v1530_v34 }
 0x1f4   :  { %v1693_v14 = vpop.f32.mrf.mxu1 }
 0x1f5   :  { %1790 = vmatmul.bf16.vlgmr.msra.gmra.mxu3 %v4255_v52  ;;  %1839 = vmatmul.bf16.vlgmr.msra.gmra.mxu0 %v4256_v7  ;;  %v1535_v22 = vadd.f32 %v1534_v39, %v1486_v21  ;;  %v4259_v52 = vld [vmem:[#allocation19_spill] sm:$0xff]  ;;  %v2834_v7 = vld [vmem:[#allocation2 + $0x2c8] sm:$0xf0] }
 0x1f7   :  { %1888 = vmatmul.bf16.vlgmr.msra.gmra.mxu1 %v4257_v49  ;;  %1776 = vmatmul.bf16.gmra.mxu2 %v4258_v8 }
 0x1f8   :  { %v1595_v45 = vpop.f32.mrf.mxu3 }
 0x1f9   :  { %v1596_v41 = vadd.f32 %v1595_v45, %v3846_v54 }
 0x1fa   :  { %v1581_v33 = vpop.f32.mrf.mxu2  ;;  %v1646_v34 = vpop.f32.mrf.mxu0 }
 0x1fb   :  { %v1645_v57 = vadd.f32 %v1644_v61, %v1596_v41  ;;  %v3980_v10 = vadd.f32 %v1581_v33, %v1533_v56  ;;  %v4260_v56 = vld [vmem:[#allocation20_spill] sm:$0xff] }
 0x1fc   :  { %v1695_v25 = vpop.f32.mrf.mxu1  ;;  %v4261_v61 = vld [vmem:[#allocation24_spill] sm:$0xff] }
 0x1fd   :  { %v1694_v0 = vadd.f32 %v1693_v14, %v1645_v57  ;;  %v3086_v14 = vld [vmem:[#allocation2 + $0x2c4] sm:$0xf]  ;;  %v2898_v57 = vld [vmem:[#allocation2 + $0x348] sm:$0xf0] }
 0x1ff   :  { %v2076_v49 = vmax.f32 %v1694_v0, 0.0 }
 0x200   :  { %v1597_v39 = vpop.f32.mrf.mxu3 }
 0x201   :  { %v1598_v51 = vadd.f32 %v1597_v39, %v3853_v20  ;;  %v2837_v20 = vor.u32 %v3086_v14, %v2834_v7 }
 0x202   :  { %v1583_v37 = vpop.f32.mrf.mxu2  ;;  %v1649_v43 = vpop.f32.mrf.mxu0 }
 0x203   :  { %v1647_v63 = vadd.f32 %v1646_v34, %v1598_v51  ;;  %v3983_v12 = vadd.f32 %v1583_v37, %v1535_v22  ;;  %1981 = vmatpush.bf16.msrb.mxu3 %v2837_v20  ;;  %v3102_v34 = vld [vmem:[#allocation2 + $0x344] sm:$0xf]  ;;  %v4262_v51 = vld [vmem:[#allocation22_spill] sm:$0xff]  ;;  %v3100_v20 = vld [vmem:[#allocation2 + $0x334] sm:$0xf] }
 0x204   :  { %v1698_v54 = vpop.f32.mrf.mxu1  ;;  %v2901_v38 = vor.u32 %v3102_v34, %v2898_v57  ;;  %v4263_v37 = vld [vmem:[#allocation23_spill] sm:$0xff]  ;;  %v4265_v57 = vld [vmem:[#allocation25_spill] sm:$0xff] }
 0x205   :  { %v1696_v21 = vadd.f32 %v1695_v25, %v1647_v63  ;;  %1795 = vmatmul.bf16.gmra.mxu3 %v4259_v52  ;;  %1844 = vmatmul.bf16.gmra.mxu0 %v4260_v56  ;;  %v2826_v63 = vld [vmem:[#allocation2 + $0x2b8] sm:$0xf0] }
 0x206   :  { %2030 = vmatpush.bf16.msrb.mxu0 %v2901_v38  ;;  %v3082_v38 = vld [vmem:[#allocation2 + $0x2a4] sm:$0xf] }
 0x207   :  { %1893 = vmatmul.bf16.gmra.mxu1 %v4261_v61  ;;  %v2078_v23 = vmax.f32 %v1696_v21, 0.0  ;;  %1937 = vmatmul.bf16.vlgmr.msra.gmra.mxu2 %v3592_v24 }
 0x208   :  { %v1600_v3 = vpop.f32.mrf.mxu3 }
 0x209   :  { %v3989_v8 = vpack.c.bf16 %v2078_v23, %v2076_v49  ;;  %v1601_v22 = vadd.f32 %v1600_v3, %v3868_v13  ;;  %v4264_v13 = vld [vmem:[#allocation27_spill] sm:$0xff]  ;;  %v2890_v3 = vld [vmem:[#allocation2 + $0x338] sm:$0xf0] }
 0x20a   :  { %v1651_v58 = vpop.f32.mrf.mxu0 }
 0x20b   :  { %v1650_v45 = vadd.f32 %v1649_v43, %v1601_v22  ;;  %v3084_v43 = vld [vmem:[#allocation2 + $0x2b4] sm:$0xf] }
 0x20c   :  { %v1700_v41 = vpop.f32.mrf.mxu1  ;;  %v2829_v21 = vor.u32 %v3084_v43, %v2826_v63 }
 0x20d   :  { %v1699_v33 = vadd.f32 %v1698_v54, %v1650_v45 }
 0x20e   :  { %1982 = vmatpush.bf16.msrb.mxu3 %v2829_v21  ;;  %v2882_v21 = vld [vmem:[#allocation2 + $0x328] sm:$0xf0] }
 0x20f   :  { %v2080_v54 = vmax.f32 %v1699_v33, 0.0 }
 0x210   :  { %v1602_v25 = vpop.f32.mrf.mxu3 }
 0x211   :  { %v1603_v0 = vadd.f32 %v1602_v25, %v3875_v29  ;;  %v4267_v25 = vld [vmem:[#allocation30_spill] sm:$0xff] }
 0x212   :  { %v1654_v48 = vpop.f32.mrf.mxu0 }
 0x213   :  { %v1652_v24 = vadd.f32 %v1651_v58, %v1603_v0  ;;  %v2893_v58 = vor.u32 %v3100_v20, %v2890_v3  ;;  %v2818_v0 = vld [vmem:[#allocation2 + $0x2a8] sm:$0xf0]  ;;  %v4269_v20 = vld [vmem:[#allocation29_spill] sm:$0xff]  ;;  %v3117_v3 = vld [vmem:[#allocation5 + $0x38] sm:$0xff] }
 0x214   :  { %v1703_v39 = vpop.f32.mrf.mxu1  ;;  %2256 = vmatpush.bf16.msrb.mxu1 %v3117_v3 }
 0x215   :  { %v1701_v27 = vadd.f32 %v1700_v41, %v1652_v24  ;;  %1800 = vmatmul.bf16.gmra.mxu3 %v4262_v51  ;;  %1849 = vmatmul.bf16.gmra.mxu0 %v4263_v37  ;;  %v2821_v24 = vor.u32 %v3082_v38, %v2818_v0 }
 0x216   :  { %2031 = vmatpush.bf16.msrb.mxu0 %v2893_v58  ;;  %v3080_v58 = vld [vmem:[#allocation2 + $0x294] sm:$0xf] }
 0x217   :  { %1898 = vmatmul.bf16.gmra.mxu1 %v4264_v13  ;;  %1942 = vmatmul.bf16.gmra.mxu2 %v3624_v53  ;;  %v2082_v52 = vmax.f32 %v1701_v27, 0.0 }
 0x218   :  { %v1605_v56 = vpop.f32.mrf.mxu3  ;;  %1983 = vmatpush.bf16.msrb.mxu3 %v2821_v24 }
 0x219   :  { %v1606_v29 = vadd.f32 %v1605_v56, %v3890_v44  ;;  %v3998_v61 = vpack.c.bf16 %v2082_v52, %v2080_v54  ;;  %v4266_v44 = vld [vmem:[#allocation26_spill] sm:$0xff]  ;;  %v3098_v54 = vld [vmem:[#allocation2 + $0x324] sm:$0xf] }
 0x21a   :  { %v1656_v14 = vpop.f32.mrf.mxu0  ;;  %v2885_v56 = vor.u32 %v3098_v54, %v2882_v21 }
 0x21b   :  { %v1655_v7 = vadd.f32 %v1654_v48, %v1606_v29  ;;  %v4008_v29 = vpop.f32.mrf.mxu2 }
 0x21c   :  { %v1705_v49 = vpop.f32.mrf.mxu1  ;;  %2032 = vmatpush.bf16.msrb.mxu0 %v2885_v56  ;;  %v4271_v56 = vld [vmem:[#allocation31_spill] sm:$0xff] }
 0x21d   :  { %v1704_v23 = vadd.f32 %v1703_v39, %v1655_v7 }
 0x21f   :  { %v2084_v48 = vmax.f32 %v1704_v23, 0.0  ;;  %v4268_v23 = vld [vmem:[#allocation28_spill] sm:$0xff] }
 0x220   :  { %v1607_v22 = vpop.f32.mrf.mxu3 }
 0x221   :  { %v1608_v45 = vadd.f32 %v1607_v22, %v3897_v59  ;;  %v4270_v22 = vld [vmem:[#allocation33_spill] sm:$0xff] }
 0x222   :  { %v1659_v41 = vpop.f32.mrf.mxu0 }
 0x223   :  { %v1657_v53 = vadd.f32 %v1656_v14, %v1608_v45  ;;  %v2810_v45 = vld [vmem:[#allocation2 + $0x298] sm:$0xf0]  ;;  %v4018_v38 = vpop.f32.mrf.mxu2 }
 0x224   :  { %v1708_v33 = vpop.f32.mrf.mxu1 }
 0x225   :  { %v1706_v34 = vadd.f32 %v1705_v49, %v1657_v53  ;;  %1805 = vmatmul.bf16.gmra.mxu3 %v4265_v57  ;;  %1854 = vmatmul.bf16.gmra.mxu0 %v4266_v44  ;;  %v2813_v53 = vor.u32 %v3080_v58, %v2810_v45  ;;  %v3116_v57 = vld [vmem:[#allocation5 + $0x30] sm:$0xff] }
 0x226   :  { %2257 = vmatpush.bf16.msrb.mxu1 %v3116_v57  ;;  %v3112_v58 = vld [vmem:[#allocation5 + $0x10] sm:$0xff] }
 0x227   :  { %1903 = vmatmul.bf16.gmra.mxu1 %v4267_v25  ;;  %1947 = vmatmul.bf16.gmra.mxu2 %v3656_v4  ;;  %v2086_v39 = vmax.f32 %v1706_v34, 0.0 }
 0x228   :  { %v1610_v27 = vpop.f32.mrf.mxu3  ;;  %1984 = vmatpush.bf16.msrb.mxu3 %v2813_v53 }
 0x229   :  { %v1611_v59 = vadd.f32 %v1610_v27, %v3912_v35  ;;  %v4006_v51 = vpack.c.bf16 %v2086_v39, %v2084_v48  ;;  %v3115_v39 = vld [vmem:[#allocation5 + $0x28] sm:$0xff]  ;;  %v3096_v27 = vld [vmem:[#allocation2 + $0x314] sm:$0xf] }
 0x22a   :  { %v1661_v37 = vpop.f32.mrf.mxu0  ;;  %2258 = vmatpush.bf16.msrb.mxu1 %v3115_v39 }
 0x22b   :  { %v1660_v13 = vadd.f32 %v1659_v41, %v1611_v59  ;;  %v4021_v21 = vpop.f32.mrf.mxu2 }
 0x22c   :  { %v1710_v43 = vpop.f32.mrf.mxu1 }
 0x22d   :  { %v1709_v63 = vadd.f32 %v1708_v33, %v1660_v13 }
 0x22f   :  { %v2088_v41 = vmax.f32 %v1709_v63, 0.0 }
 0x230   :  { %v1612_v52 = vpop.f32.mrf.mxu3 }
 0x231   :  { %v1613_v4 = vadd.f32 %v1612_v52, %v3919_v60 }
 0x232   :  { %v1664_v14 = vpop.f32.mrf.mxu0 }
 0x233   :  { %v1662_v7 = vadd.f32 %v1661_v37, %v1613_v4  ;;  %v4272_v4 = vld [vmem:[#allocation32_spill] sm:$0xff]  ;;  %v4030_v57 = vpop.f32.mrf.mxu2 }
 0x234   :  { %v1713_v49 = vpop.f32.mrf.mxu1 }
 0x235   :  { %v1711_v35 = vadd.f32 %v1710_v43, %v1662_v7  ;;  %1810 = vmatmul.bf16.gmra.mxu3 %v4268_v23  ;;  %1859 = vmatmul.bf16.gmra.mxu0 %v4269_v20  ;;  %v4273_v7 = vld [vmem:[#allocation34_spill] sm:$0xff] }
 0x237   :  { %1908 = vmatmul.bf16.gmra.mxu1 %v4270_v22  ;;  %1952 = vmatmul.bf16.gmra.mxu2 %v3688_v31  ;;  %v2090_v60 = vmax.f32 %v1711_v35, 0.0  ;;  %v2874_v31 = vld [vmem:[#allocation2 + $0x318] sm:$0xf0]  ;;  %v2802_v35 = vld [vmem:[#allocation2 + $0x288] sm:$0xf0] }
 0x238   :  { %v1615_v33 = vpop.f32.mrf.mxu3  ;;  %v2877_v37 = vor.u32 %v3096_v27, %v2874_v31 }
 0x239   :  { %v1616_v34 = vadd.f32 %v1615_v33, %v3934_v36  ;;  %v4016_v44 = vpack.c.bf16 %v2090_v60, %v2088_v41  ;;  %v3114_v36 = vld [vmem:[#allocation5 + $0x20] sm:$0xff] }
 0x23a   :  { %v1666_v25 = vpop.f32.mrf.mxu0  ;;  %2033 = vmatpush.bf16.msrb.mxu0 %v2877_v37  ;;  %2259 = vmatpush.bf16.msrb.mxu1 %v3114_v36  ;;  %v4274_v37 = vld [vmem:[#allocation13_spill] sm:$0xff]  ;;  %v4276_v36 = vld [vmem:[#allocation35_spill] sm:$0xff] }
 0x23b   :  { %v1665_v0 = vadd.f32 %v1664_v14, %v1616_v34  ;;  %v3113_v14 = vld [vmem:[#allocation5 + $0x18] sm:$0xff]  ;;  %v3111_v34 = vld [vmem:[#allocation5 + $0x8] sm:$0xff] }
 0x23c   :  { %v1715_v48 = vpop.f32.mrf.mxu1 }
 0x23d   :  { %v1714_v24 = vadd.f32 %v1713_v49, %v1665_v0  ;;  %v3078_v49 = vld [vmem:[#allocation2 + $0x284] sm:$0xf] }
 0x23e   :  { %2260 = vmatpush.bf16.msrb.mxu1 %v3113_v14 }
 0x23f   :  { %v2092_v23 = vmax.f32 %v1714_v24, 0.0 }
 0x240   :  { %v1617_v59 = vpop.f32.mrf.mxu3 }
 0x241   :  { %v1618_v13 = vadd.f32 %v1617_v59, %v3941_v19  ;;  %v2805_v19 = vor.u32 %v3078_v49, %v2802_v35 }
 0x242   :  { %v1669_v43 = vpop.f32.mrf.mxu0  ;;  %2261 = vmatpush.bf16.msrb.mxu1 %v3112_v58  ;;  %v4277_v58 = vld [vmem:[#allocation14_spill] sm:$0xff] }
 0x243   :  { %v1667_v63 = vadd.f32 %v1666_v25, %v1618_v13  ;;  %1985 = vmatpush.bf16.msrb.mxu3 %v2805_v19  ;;  %v3094_v25 = vld [vmem:[#allocation2 + $0x304] sm:$0xf] }
 0x244   :  { %v1718_v54 = vpop.f32.mrf.mxu1  ;;  %v4275_v13 = vld [vmem:[#allocation15_spill] sm:$0xff] }
 0x245   :  { %v1716_v52 = vadd.f32 %v1715_v48, %v1667_v63  ;;  %1815 = vmatmul.bf16.gmra.mxu3 %v4271_v56  ;;  %1864 = vmatmul.bf16.gmra.mxu0 %v4272_v4 }
 0x246   :  { %2262 = vmatpush.bf16.msrb.mxu1 %v3111_v34 }
 0x247   :  { %1913 = vmatmul.bf16.gmra.mxu1 %v4273_v7  ;;  %1957 = vmatmul.bf16.gmra.mxu2 %v3720_v5  ;;  %v2094_v20 = vmax.f32 %v1716_v52, 0.0  ;;  %v2866_v5 = vld [vmem:[#allocation2 + $0x308] sm:$0xf0]  ;;  %v4037_v52 = vpop.f32.mrf.mxu2 }
 0x248   :  { %v1620_v3 = vpop.f32.mrf.mxu3  ;;  %v2869_v48 = vor.u32 %v3094_v25, %v2866_v5 }
 0x249   :  { %v1621_v22 = vadd.f32 %v1620_v3, %v3956_v30  ;;  %v4028_v45 = vpack.c.bf16 %v2094_v20, %v2092_v23  ;;  %v3110_v30 = vld [vmem:[#allocation5] sm:$0xff] }
 0x24a   :  { %v1671_v41 = vpop.f32.mrf.mxu0  ;;  %2034 = vmatpush.bf16.msrb.mxu0 %v2869_v48  ;;  %2263 = vmatpush.bf16.msrb.mxu1 %v3110_v30  ;;  %v3125_v48 = vld [vmem:[#allocation5 + $0x78] sm:$0xff] }
 0x24b   :  { %v1670_v53 = vadd.f32 %v1669_v43, %v1621_v22  ;;  %2305 = vmatpush.bf16.msrb.mxu2 %v3125_v48 }
 0x24c   :  { %v1720_v60 = vpop.f32.mrf.mxu1 }
 0x24d   :  { %v1719_v33 = vadd.f32 %v1718_v54, %v1670_v53 }
 0x24f   :  { %v2096_v43 = vmax.f32 %v1719_v33, 0.0  ;;  %v4043_v20 = vpop.f32.mrf.mxu2 }
 0x250   :  { %v1622_v0 = vpop.f32.mrf.mxu3 }
 0x251   :  { %v1623_v24 = vadd.f32 %v1622_v0, %v3963_v46 }
 0x252   :  { %v1674_v39 = vpop.f32.mrf.mxu0 }
 0x253   :  { %v1672_v27 = vadd.f32 %v1671_v41, %v1623_v24  ;;  %v4278_v41 = vld [vmem:[#allocation18_spill] sm:$0xff] }
 0x254   :  { %v1723_v31 = vpop.f32.mrf.mxu1 }
 0x255   :  { %v1721_v59 = vadd.f32 %v1720_v60, %v1672_v27  ;;  %1820 = vmatmul.bf16.gmra.mxu3 %v4274_v37  ;;  %1869 = vmatmul.bf16.gmra.mxu0 %v4275_v13 }
 0x257   :  { %1918 = vmatmul.bf16.gmra.mxu1 %v4276_v36  ;;  %1962 = vmatmul.bf16.gmra.mxu2 %v3744_v32  ;;  %v2098_v63 = vmax.f32 %v1721_v59, 0.0  ;;  %v4052_v24 = vpop.f32.mrf.mxu2  ;;  %v4280_v36 = vld [vmem:[#allocation36_spill] sm:$0xff] }
 0x258   :  { %v1625_v54 = vpop.f32.mrf.mxu3 }
 0x259   :  { %v1626_v46 = vadd.f32 %v1625_v54, %v3970_v15  ;;  %v4040_v56 = vpack.c.bf16 %v2098_v63, %v2096_v43  ;;  %v4279_v15 = vld [vmem:[#allocation38_spill] sm:$0xff]  ;;  %v4281_v43 = vld [vmem:[#allocation37_spill] sm:$0xff] }
 0x25a   :  { %v1676_v4 = vpop.f32.mrf.mxu0 }
 0x25b   :  { %v1675_v14 = vadd.f32 %v1674_v39, %v1626_v46 }
 0x25c   :  { %v1725_v7 = vpop.f32.mrf.mxu1 }
 0x25d   :  { %v1724_v49 = vadd.f32 %v1723_v31, %v1675_v14 }
 0x25f   :  { %v2100_v53 = vmax.f32 %v1724_v49, 0.0 }
 0x260   :  { %v1627_v35 = vpop.f32.mrf.mxu3 }
 0x261   :  { %v1628_v23 = vadd.f32 %v1627_v35, %v3973_v28 }
 0x262   :  { %v1679_v19 = vpop.f32.mrf.mxu0 }
 0x263   :  { %v1677_v3 = vadd.f32 %v1676_v4, %v1628_v23 }
 0x264   :  { %v1728_v32 = vpop.f32.mrf.mxu1 }
 0x265   :  { %v1726_v22 = vadd.f32 %v1725_v7, %v1677_v3  ;;  %1825 = vmatmul.bf16.gmra.mxu3 %v4277_v58  ;;  %1874 = vmatmul.bf16.gmra.mxu0 %v4278_v41  ;;  %v4282_v41 = vld [vmem:[#allocation39_spill] sm:$0xff] }
 0x267   :  { %1923 = vmatmul.bf16.gmra.mxu1 %v4279_v15  ;;  %1967 = vmatmul.bf16.gmra.mxu2 %v3762_v1  ;;  %v2102_v60 = vmax.f32 %v1726_v22, 0.0  ;;  %v3138_v1 = vld [vmem:[%s4192_s4] sm:$0x3] }
 0x268   :  { %v1630_v33 = vpop.f32.mrf.mxu3  ;;  %v4058_v59 = vperm.slane %v3138_v1, 1 }
 0x269   :  { %v1631_v34 = vadd.f32 %v1630_v33, %v3980_v10  ;;  %v4050_v28 = vpack.c.bf16 %v2102_v60, %v2100_v53 }
 0x26a   :  { %v1681_v25 = vpop.f32.mrf.mxu0  ;;  %v1743_v63 = vadd.f32 %v4008_v29, %v4058_v59  ;;  %v1748_v60 = vadd.f32 %v4021_v21, %v4058_v59 }
 0x26b   :  { %v1680_v5 = vadd.f32 %v1679_v19, %v1631_v34  ;;  %v3124_v19 = vld [vmem:[#allocation5 + $0x70] sm:$0xff] }
 0x26c   :  { %v1730_v0 = vpop.f32.mrf.mxu1  ;;  %2306 = vmatpush.bf16.msrb.mxu2 %v3124_v19 }
 0x26d   :  { %v1729_v30 = vadd.f32 %v1728_v32, %v1680_v5  ;;  %v3123_v5 = vld [vmem:[#allocation5 + $0x68] sm:$0xff] }
 0x26f   :  { %v2104_v54 = vmax.f32 %v1729_v30, 0.0 }
 0x270   :  { %v1632_v39 = vpop.f32.mrf.mxu3  ;;  %2307 = vmatpush.bf16.msrb.mxu2 %v3123_v5 }
 0x271   :  { %v1633_v27 = vadd.f32 %v1632_v39, %v3983_v12  ;;  %v4065_v12 = vpop.f32.mrf.mxu2 }
 0x272   :  { %v1840_v31 = vpop.f32.mrf.mxu0 }
 0x273   :  { %v1682_v10 = vadd.f32 %v1681_v25, %v1633_v27 }
 0x274   :  { %v1889_v37 = vpop.f32.mrf.mxu1 }
 0x275   :  { %v1731_v13 = vadd.f32 %v1730_v0, %v1682_v10  ;;  %1986 = vmatmul.bf16.vlgmr.msrb.gmra.mxu3 %v4280_v36  ;;  %2035 = vmatmul.bf16.vlgmr.msrb.gmra.mxu0 %v4281_v43  ;;  %v1753_v10 = vadd.f32 %v4037_v52, %v4058_v59 }
 0x277   :  { %2264 = vmatmul.bf16.vlgmr.msrb.gmra.mxu1 %v3989_v8  ;;  %1972 = vmatmul.bf16.gmra.mxu2 %v3797_v50  ;;  %v2106_v46 = vmax.f32 %v1731_v13, 0.0  ;;  %v1745_v8 = vadd.f32 %v4018_v38, %v4058_v59 }
 0x278   :  { %v1791_v4 = vpop.f32.mrf.mxu3 }
 0x279   :  { %v1792_v14 = vadd.f32 %v1791_v4, %v1743_v63  ;;  %v4068_v7 = vpack.c.bf16 %v2106_v46, %v2104_v54  ;;  %v1762_v53 = vpop.f32.mrf.mxu2  ;;  %v3122_v63 = vld [vmem:[#allocation5 + $0x60] sm:$0xff] }
 0x27a   :  { %v1842_v49 = vpop.f32.mrf.mxu0  ;;  %2308 = vmatpush.bf16.msrb.mxu2 %v3122_v63 }
 0x27b   :  { %v1841_v35 = vadd.f32 %v1840_v31, %v1792_v14 }
 0x27c   :  { %v1891_v23 = vpop.f32.mrf.mxu1 }
 0x27d   :  { %v4070_v3 = vadd.f32 %v1889_v37, %v1841_v35  ;;  %v1758_v35 = vadd.f32 %v4052_v24, %v4058_v59 }
 0x280   :  { %v1793_v29 = vpop.f32.mrf.mxu3 }
 0x281   :  { %v1794_v32 = vadd.f32 %v1793_v29, %v1745_v8  ;;  %v1764_v30 = vpop.f32.mrf.mxu2 }
 0x282   :  { %v1845_v22 = vpop.f32.mrf.mxu0 }
 0x283   :  { %v1843_v58 = vadd.f32 %v1842_v49, %v1794_v32  ;;  %v3121_v32 = vld [vmem:[#allocation5 + $0x58] sm:$0xff] }
 0x284   :  { %v1894_v50 = vpop.f32.mrf.mxu1  ;;  %2309 = vmatpush.bf16.msrb.mxu2 %v3121_v32 }
 0x285   :  { %1991 = vmatmul.bf16.gmra.mxu3 %v3829_v26  ;;  %2040 = vmatmul.bf16.gmra.mxu0 %v4282_v41  ;;  %v4076_v15 = vadd.f32 %v1891_v23, %v1843_v58  ;;  %v1750_v26 = vadd.f32 %v4030_v57, %v4058_v59 }
 0x287   :  { %2269 = vmatmul.bf16.gmra.mxu1 %v3998_v61 }
 0x288   :  { %v1796_v33 = vpop.f32.mrf.mxu3 }
 0x289   :  { %v1797_v34 = vadd.f32 %v1796_v33, %v1748_v60  ;;  %v1767_v57 = vpop.f32.mrf.mxu2  ;;  %v1763_v33 = vadd.f32 %v1762_v53, %v4058_v59 }
 0x28a   :  { %v1847_v38 = vpop.f32.mrf.mxu0 }
 0x28b   :  { %v1846_v25 = vadd.f32 %v1845_v22, %v1797_v34 }
 0x28c   :  { %v1896_v0 = vpop.f32.mrf.mxu1 }
 0x28d   :  { %v4081_v48 = vadd.f32 %v1894_v50, %v1846_v25 }
 0x290   :  { %v1798_v39 = vpop.f32.mrf.mxu3 }
 0x291   :  { %v1799_v27 = vadd.f32 %v1798_v39, %v1750_v26  ;;  %v1769_v49 = vpop.f32.mrf.mxu2  ;;  %v1765_v26 = vadd.f32 %v1764_v30, %v4058_v59  ;;  %v3119_v30 = vld [vmem:[#allocation5 + $0x48] sm:$0xff] }
 0x292   :  { %v1850_v31 = vpop.f32.mrf.mxu0 }
 0x293   :  { %v1848_v61 = vadd.f32 %v1847_v38, %v1799_v27 }
 0x294   :  { %v1899_v1 = vpop.f32.mrf.mxu1 }
 0x295   :  { %1996 = vmatmul.bf16.gmra.mxu3 %v3849_v2  ;;  %2045 = vmatmul.bf16.gmra.mxu0 %v3851_v9  ;;  %v4087_v21 = vadd.f32 %v1896_v0, %v1848_v61  ;;  %v1755_v2 = vadd.f32 %v4043_v20, %v4058_v59  ;;  %v3120_v0 = vld [vmem:[#allocation5 + $0x50] sm:$0xff] }
 0x296   :  { %2310 = vmatpush.bf16.msrb.mxu2 %v3120_v0 }
 0x297   :  { %2274 = vmatmul.bf16.gmra.mxu1 %v4006_v51 }
 0x298   :  { %v1801_v37 = vpop.f32.mrf.mxu3 }
 0x299   :  { %v1802_v13 = vadd.f32 %v1801_v37, %v1753_v10  ;;  %v1772_v58 = vpop.f32.mrf.mxu2 }
 0x29a   :  { %v1852_v36 = vpop.f32.mrf.mxu0  ;;  %2311 = vmatpush.bf16.msrb.mxu2 %v3119_v30 }
 0x29b   :  { %v1851_v43 = vadd.f32 %v1850_v31, %v1802_v13  ;;  %v1770_v13 = vadd.f32 %v1769_v49, %v4058_v59 }
 0x29c   :  { %v1901_v9 = vpop.f32.mrf.mxu1 }
 0x29d   :  { %v4092_v54 = vadd.f32 %v1899_v1, %v1851_v43 }
 0x2a0   :  { %v1803_v46 = vpop.f32.mrf.mxu3 }
 0x2a1   :  { %v1804_v4 = vadd.f32 %v1803_v46, %v1755_v2  ;;  %v1774_v34 = vpop.f32.mrf.mxu2 }
 0x2a2   :  { %v1855_v14 = vpop.f32.mrf.mxu0 }
 0x2a3   :  { %v1853_v51 = vadd.f32 %v1852_v36, %v1804_v4  ;;  %v3118_v4 = vld [vmem:[#allocation5 + $0x40] sm:$0xff] }
 0x2a4   :  { %v1904_v20 = vpop.f32.mrf.mxu1  ;;  %2312 = vmatpush.bf16.msrb.mxu2 %v3118_v4 }
 0x2a5   :  { %2001 = vmatmul.bf16.gmra.mxu3 %v3871_v42  ;;  %2050 = vmatmul.bf16.gmra.mxu0 %v3873_v17  ;;  %v4098_v52 = vadd.f32 %v1901_v9, %v1853_v51  ;;  %v1760_v42 = vadd.f32 %v4065_v12, %v4058_v59 }
 0x2a7   :  { %2279 = vmatmul.bf16.gmra.mxu1 %v4016_v44 }
 0x2a8   :  { %v1806_v23 = vpop.f32.mrf.mxu3 }
 0x2a9   :  { %v1807_v19 = vadd.f32 %v1806_v23, %v1758_v35  ;;  %v1777_v27 = vpop.f32.mrf.mxu2 }
 0x2aa   :  { %v1857_v8 = vpop.f32.mrf.mxu0 }
 0x2ab   :  { %v1856_v29 = vadd.f32 %v1855_v14, %v1807_v19  ;;  %v1775_v14 = vadd.f32 %v1774_v34, %v4058_v59 }
 0x2ac   :  { %v1906_v60 = vpop.f32.mrf.mxu1 }
 0x2ad   :  { %v4103_v22 = vadd.f32 %v1904_v20, %v1856_v29 }
 0x2b0   :  { %v1808_v17 = vpop.f32.mrf.mxu3 }
 0x2b1   :  { %v1809_v50 = vadd.f32 %v1808_v17, %v1760_v42  ;;  %v1779_v37 = vpop.f32.mrf.mxu2 }
 0x2b2   :  { %v1860_v41 = vpop.f32.mrf.mxu0  ;;  %v1780_v32 = vadd.f32 %v1779_v37, %v4058_v59 }
 0x2b3   :  { %v1858_v44 = vadd.f32 %v1857_v8, %v1809_v50 }
 0x2b5   :  { %2006 = vmatmul.bf16.gmra.mxu3 %v3893_v11  ;;  %2055 = vmatmul.bf16.gmra.mxu0 %v3895_v62  ;;  %v4109_v24 = vadd.f32 %v1906_v60, %v1858_v44 }
 0x2b7   :  { %2284 = vmatmul.bf16.gmra.mxu1 %v4028_v45  ;;  %v1768_v45 = vadd.f32 %v1767_v57, %v4058_v59 }
 0x2b8   :  { %v1811_v38 = vpop.f32.mrf.mxu3 }
 0x2b9   :  { %v1812_v25 = vadd.f32 %v1811_v38, %v1763_v33 }
 0x2ba   :  { %v1862_v5 = vpop.f32.mrf.mxu0 }
 0x2bb   :  { %v4113_v12 = vadd.f32 %v1860_v41, %v1812_v25 }
 0x2c0   :  { %v1813_v39 = vpop.f32.mrf.mxu3 }
 0x2c1   :  { %v1814_v11 = vadd.f32 %v1813_v39, %v1765_v26 }
 0x2c2   :  { %v1865_v62 = vpop.f32.mrf.mxu0 }
 0x2c3   :  { %v4116_v31 = vadd.f32 %v1862_v5, %v1814_v11 }
 0x2c5   :  { %2011 = vmatmul.bf16.gmra.mxu3 %v3915_v16  ;;  %2060 = vmatmul.bf16.gmra.mxu0 %v3917_v55  ;;  %v1938_v55 = vpop.f32.mrf.mxu2 }
 0x2c7   :  { %2289 = vmatmul.bf16.gmra.mxu1 %v4040_v56  ;;  %v1773_v56 = vadd.f32 %v1772_v58, %v4058_v59 }
 0x2c8   :  { %v1816_v53 = vpop.f32.mrf.mxu3 }
 0x2c9   :  { %v1817_v61 = vadd.f32 %v1816_v53, %v1768_v45 }
 0x2ca   :  { %v1867_v1 = vpop.f32.mrf.mxu0 }
 0x2cb   :  { %v4122_v10 = vadd.f32 %v1865_v62, %v1817_v61 }
 0x2cd   :  { %v1940_v51 = vpop.f32.mrf.mxu2 }
 0x2ce   :  { %v1941_v33 = vadd.f32 %v1940_v51, %v4076_v15 }
 0x2d0   :  { %v1818_v36 = vpop.f32.mrf.mxu3 }
 0x2d1   :  { %v1819_v43 = vadd.f32 %v1818_v36, %v1770_v13 }
 0x2d2   :  { %v1870_v63 = vpop.f32.mrf.mxu0 }
 0x2d3   :  { %v4125_v16 = vadd.f32 %v1867_v1, %v1819_v43 }
 0x2d5   :  { %2016 = vmatmul.bf16.gmra.mxu3 %v3937_v18  ;;  %2065 = vmatmul.bf16.gmra.mxu0 %v3939_v6  ;;  %v1778_v6 = vadd.f32 %v1777_v27, %v4058_v59  ;;  %v1943_v20 = vpop.f32.mrf.mxu2 }
 0x2d6   :  { %v1944_v45 = vadd.f32 %v1943_v20, %v4081_v48 }
 0x2d7   :  { %2294 = vmatmul.bf16.gmra.mxu1 %v4050_v28 }
 0x2d8   :  { %v1821_v57 = vpop.f32.mrf.mxu3 }
 0x2d9   :  { %v1822_v2 = vadd.f32 %v1821_v57, %v1773_v56  ;;  %v1909_v56 = vpop.f32.mrf.mxu1 }
 0x2da   :  { %v1872_v9 = vpop.f32.mrf.mxu0 }
 0x2db   :  { %v4131_v46 = vadd.f32 %v1870_v63, %v1822_v2 }
 0x2e0   :  { %v1823_v49 = vpop.f32.mrf.mxu3 }
 0x2e1   :  { %v1824_v35 = vadd.f32 %v1823_v49, %v1775_v14 }
 0x2e2   :  { %v1875_v18 = vpop.f32.mrf.mxu0 }
 0x2e3   :  { %v4134_v23 = vadd.f32 %v1872_v9, %v1824_v35 }
 0x2e5   :  { %2021 = vmatmul.bf16.gmra.mxu3 %v3959_v47  ;;  %2070 = vmatmul.bf16.gmra.mxu0 %v3961_v40  ;;  %v1945_v47 = vpop.f32.mrf.mxu2 }
 0x2e7   :  { %2299 = vmatmul.bf16.gmra.mxu1 %v4068_v7  ;;  %v1939_v7 = vadd.f32 %v1938_v55, %v4070_v3  ;;  %v1946_v3 = vadd.f32 %v1945_v47, %v4087_v21 }
 0x2e8   :  { %v1826_v28 = vpop.f32.mrf.mxu3 }
 0x2e9   :  { %v1827_v19 = vadd.f32 %v1826_v28, %v1778_v6 }
 0x2ea   :  { %v1877_v8 = vpop.f32.mrf.mxu0 }
 0x2eb   :  { %v4140_v29 = vadd.f32 %v1875_v18, %v1827_v19  ;;  %v1911_v18 = vpop.f32.mrf.mxu1 }
 0x2ed   :  { %v1948_v60 = vpop.f32.mrf.mxu2 }
 0x2ee   :  { %v1949_v2 = vadd.f32 %v1948_v60, %v4092_v54 }
 0x2f0   :  { %v1828_v58 = vpop.f32.mrf.mxu3 }
 0x2f1   :  { %v1829_v42 = vadd.f32 %v1828_v58, %v1780_v32 }
 0x2f2   :  { %v2036_v17 = vpop.f32.mrf.mxu0 }
 0x2f3   :  { %v4143_v50 = vadd.f32 %v1877_v8, %v1829_v42  ;;  %v1914_v42 = vpop.f32.mrf.mxu1 }
 0x2f5   :  { %v1950_v11 = vpop.f32.mrf.mxu2 }
 0x2f6   :  { %v1951_v4 = vadd.f32 %v1950_v11, %v4098_v52 }
 0x2f8   :  { %v1987_v41 = vpop.f32.mrf.mxu3 }
 0x2f9   :  { %v1988_v44 = vadd.f32 %v1987_v41, %v1939_v7 }
 0x2fa   :  { %v2038_v40 = vpop.f32.mrf.mxu0 }
 0x2fb   :  { %v2037_v38 = vadd.f32 %v2036_v17, %v1988_v44 }
 0x2fd   :  { %v2077_v59 = vmax.f32 %v2037_v38, 0.0  ;;  %v1953_v30 = vpop.f32.mrf.mxu2  ;;  %v1916_v38 = vpop.f32.mrf.mxu1 }
 0x2fe   :  { %v1954_v58 = vadd.f32 %v1953_v30, %v4103_v22 }
 0x300   :  { %v1989_v34 = vpop.f32.mrf.mxu3 }
 0x301   :  { %v1990_v25 = vadd.f32 %v1989_v34, %v1941_v33 }
 0x302   :  { %v2041_v5 = vpop.f32.mrf.mxu0 }
 0x303   :  { %v2039_v0 = vadd.f32 %v2038_v40, %v1990_v25 }
 0x305   :  { %v2079_v26 = vmax.f32 %v2039_v0, 0.0  ;;  %v1955_v9 = vpop.f32.mrf.mxu2 }
 0x306   :  { %v1956_v17 = vadd.f32 %v1955_v9, %v4109_v24 }
 0x307   :  { %v2109_v39 = vpack.c.bf16 %v2079_v26, %v2077_v59  ;;  %v1912_v26 = vadd.f32 %v1911_v18, %v4116_v31  ;;  %v1917_v31 = vadd.f32 %v1916_v38, %v4125_v16 }
 0x308   :  { %v1992_v27 = vpop.f32.mrf.mxu3 }
 0x309   :  { %2313 = vmatmul.bf16.vlgmr.msrb.gmra.mxu2 %v2109_v39  ;;  %v1993_v53 = vadd.f32 %v1992_v27, %v1944_v45  ;;  %v1919_v45 = vpop.f32.mrf.mxu1 }
 0x30a   :  { %v2043_v62 = vpop.f32.mrf.mxu0  ;;  %v1920_v18 = vadd.f32 %v1919_v45, %v4131_v46 }
 0x30b   :  { %v2042_v1 = vadd.f32 %v2041_v5, %v1993_v53  ;;  %v1910_v5 = vadd.f32 %v1909_v56, %v4113_v12  ;;  %v1915_v12 = vadd.f32 %v1914_v42, %v4122_v10 }
 0x30d   :  { %v2081_v36 = vmax.f32 %v2042_v1, 0.0  ;;  %v1958_v19 = vpop.f32.mrf.mxu2 }
 0x30e   :  { %v1959_v59 = vadd.f32 %v1958_v19, %v1910_v5 }
 0x310   :  { %v1994_v61 = vpop.f32.mrf.mxu3 }
 0x311   :  { %v1995_v15 = vadd.f32 %v1994_v61, %v1946_v3 }
 0x312   :  { %v2046_v37 = vpop.f32.mrf.mxu0 }
 0x313   :  { %v2044_v13 = vadd.f32 %v2043_v62, %v1995_v15 }
 0x315   :  { %v2083_v43 = vmax.f32 %v2044_v13, 0.0  ;;  %v1960_v52 = vpop.f32.mrf.mxu2 }
 0x316   :  { %v1961_v39 = vadd.f32 %v1960_v52, %v1912_v26 }
 0x317   :  { %v2111_v63 = vpack.c.bf16 %v2083_v43, %v2081_v36  ;;  %v1921_v43 = vpop.f32.mrf.mxu1 }
 0x318   :  { %v1997_v55 = vpop.f32.mrf.mxu3  ;;  %v1922_v16 = vadd.f32 %v1921_v43, %v4134_v23 }
 0x319   :  { %2318 = vmatmul.bf16.gmra.mxu2 %v2111_v63  ;;  %v1998_v48 = vadd.f32 %v1997_v55, %v1949_v2 }
 0x31a   :  { %v2048_v57 = vpop.f32.mrf.mxu0 }
 0x31b   :  { %v2047_v14 = vadd.f32 %v2046_v37, %v1998_v48 }
 0x31d   :  { %v2085_v6 = vmax.f32 %v2047_v14, 0.0  ;;  %v1963_v0 = vpop.f32.mrf.mxu2 }
 0x31e   :  { %v1964_v36 = vadd.f32 %v1963_v0, %v1915_v12 }
 0x320   :  { %v1999_v21 = vpop.f32.mrf.mxu3 }
 0x321   :  { %v2000_v51 = vadd.f32 %v1999_v21, %v1951_v4 }
 0x322   :  { %v2051_v49 = vpop.f32.mrf.mxu0 }
 0x323   :  { %v2049_v35 = vadd.f32 %v2048_v57, %v2000_v51  ;;  %v1924_v51 = vpop.f32.mrf.mxu1 }
 0x324   :  { %v1925_v46 = vadd.f32 %v1924_v51, %v4140_v29  ;;  %v4164_v29 = vld [vmem:[%s4194_s6] ss:$0 sm:$0xff]  ;;  %s3223_s6 = smov [#allocation7]  }
 0x325   :  { %v2087_v28 = vmax.f32 %v2049_v35, 0.0  ;;  %v1965_v61 = vpop.f32.mrf.mxu2  ;;  %s2374_s20 = sshll.u32 %s3223_s6, 4  ;;  %s2375_s20 = int_to_ptr.vmem [resolvable:$true] %s2374_s20 }
 0x326   :  { %v1966_v56 = vadd.f32 %v1965_v61, %v1917_v31 }
 0x327   :  { %v2113_v20 = vpack.c.bf16 %v2087_v28, %v2085_v6 }
 0x328   :  { %v2002_v8 = vpop.f32.mrf.mxu3 }
 0x329   :  { %2323 = vmatmul.bf16.gmra.mxu2 %v2113_v20  ;;  %v2003_v54 = vadd.f32 %v2002_v8, %v1954_v58 }
 0x32a   :  { %v2053_v32 = vpop.f32.mrf.mxu0 }
 0x32b   :  { %v2052_v41 = vadd.f32 %v2051_v49, %v2003_v54  ;;  %v1926_v8 = vpop.f32.mrf.mxu1 }
 0x32d   :  { %v2089_v60 = vmax.f32 %v2052_v41, 0.0  ;;  %v1968_v55 = vpop.f32.mrf.mxu2 }
 0x32e   :  { %v1969_v6 = vadd.f32 %v1968_v55, %v1920_v18 }
 0x330   :  { %v2004_v47 = vpop.f32.mrf.mxu3 }
 0x331   :  { %v2005_v40 = vadd.f32 %v2004_v47, %v1956_v17 }
 0x332   :  { %v2056_v7 = vpop.f32.mrf.mxu0 }
 0x333   :  { %v2054_v44 = vadd.f32 %v2053_v32, %v2005_v40 }
 0x335   :  { %v2091_v33 = vmax.f32 %v2054_v44, 0.0  ;;  %v1970_v35 = vpop.f32.mrf.mxu2  ;;  %v2265_v44 = vpop.f32.mrf.mxu1 }
 0x336   :  { %v1971_v20 = vadd.f32 %v1970_v35, %v1922_v16 }
 0x337   :  { %v2115_v34 = vpack.c.bf16 %v2091_v33, %v2089_v60  ;;  %v1927_v33 = vadd.f32 %v1926_v8, %v4143_v50  ;;  %v2266_v50 = vadd.f32 %v4164_v29, %v2265_v44 }
 0x338   :  { %v2007_v25 = vpop.f32.mrf.mxu3 }
 0x339   :  { %2328 = vmatmul.bf16.gmra.mxu2 %v2115_v34  ;;  %v2008_v24 = vadd.f32 %v2007_v25, %v1959_v59 }
 0x33a   :  { %v2058_v22 = vpop.f32.mrf.mxu0 }
 0x33b   :  { %v2057_v27 = vadd.f32 %v2056_v7, %v2008_v24 }
 0x33d   :  { %v2093_v1 = vmax.f32 %v2057_v27, 0.0  ;;  %v1973_v42 = vpop.f32.mrf.mxu2  ;;  %v2267_v26 = vpop.f32.mrf.mxu1 }
 0x33e   :  { %v1974_v60 = vadd.f32 %v1973_v42, %v1925_v46  ;;  %v2268_v61 = vadd.f32 %v4164_v29, %v2267_v26 }
 0x340   :  { %v2009_v11 = vpop.f32.mrf.mxu3 }
 0x341   :  { %v2010_v62 = vadd.f32 %v2009_v11, %v1961_v39 }
 0x342   :  { %v2061_v53 = vpop.f32.mrf.mxu0 }
 0x343   :  { %v2059_v3 = vadd.f32 %v2058_v22, %v2010_v62 }
 0x345   :  { %v2095_v15 = vmax.f32 %v2059_v3, 0.0  ;;  %v1975_v23 = vpop.f32.mrf.mxu2  ;;  %v2270_v27 = vpop.f32.mrf.mxu1 }
 0x346   :  { %v1976_v38 = vadd.f32 %v1975_v23, %v1927_v33 }
 0x347   :  { %v2117_v30 = vpack.c.bf16 %v2095_v15, %v2093_v1 }
 0x348   :  { %v2012_v37 = vpop.f32.mrf.mxu3 }
 0x349   :  { %2333 = vmatmul.bf16.gmra.mxu2 %v2117_v30  ;;  %v2013_v63 = vadd.f32 %v2012_v37, %v1964_v36  ;;  %v2271_v30 = vadd.f32 %v4164_v29, %v2270_v27 }
 0x34a   :  { %v2063_v13 = vpop.f32.mrf.mxu0 }
 0x34b   :  { %v2062_v2 = vadd.f32 %v2061_v53, %v2013_v63 }
 0x34d   :  { %v2097_v21 = vmax.f32 %v2062_v2, 0.0  ;;  %v2272_v62 = vpop.f32.mrf.mxu1 }
 0x34e   :  { %v2273_v36 = vadd.f32 %v4164_v29, %v2272_v62 }
 0x350   :  { %v2014_v57 = vpop.f32.mrf.mxu3 }
 0x351   :  { %v2015_v9 = vadd.f32 %v2014_v57, %v1966_v56 }
 0x352   :  { %v2066_v4 = vpop.f32.mrf.mxu0 }
 0x353   :  { %v2064_v48 = vadd.f32 %v2063_v13, %v2015_v9 }
 0x355   :  { %v2099_v14 = vmax.f32 %v2064_v48, 0.0  ;;  %v2275_v3 = vpop.f32.mrf.mxu1 }
 0x356   :  { %v2276_v55 = vadd.f32 %v4164_v29, %v2275_v3 }
 0x357   :  { %v2119_v49 = vpack.c.bf16 %v2099_v14, %v2097_v21 }
 0x358   :  { %v2017_v10 = vpop.f32.mrf.mxu3 }
 0x359   :  { %2338 = vmatmul.bf16.gmra.mxu2 %v2119_v49  ;;  %v2018_v28 = vadd.f32 %v2017_v10, %v1969_v6 }
 0x35a   :  { %v2068_v19 = vpop.f32.mrf.mxu0 }
 0x35b   :  { %v2067_v58 = vadd.f32 %v2066_v4, %v2018_v28 }
 0x35d   :  { %v2101_v52 = vmax.f32 %v2067_v58, 0.0  ;;  %v2277_v37 = vpop.f32.mrf.mxu1 }
 0x35e   :  { %v2278_v9 = vadd.f32 %v4164_v29, %v2277_v37 }
 0x360   :  { %v2019_v32 = vpop.f32.mrf.mxu3 }
 0x361   :  { %v2020_v54 = vadd.f32 %v2019_v32, %v1971_v20 }
 0x362   :  { %v2071_v40 = vpop.f32.mrf.mxu0 }
 0x363   :  { %v2069_v17 = vadd.f32 %v2068_v19, %v2020_v54 }
 0x365   :  { %v2103_v47 = vmax.f32 %v2069_v17, 0.0  ;;  %v2280_v63 = vpop.f32.mrf.mxu1 }
 0x366   :  { %v2281_v14 = vadd.f32 %v4164_v29, %v2280_v63 }
 0x367   :  { %v2121_v41 = vpack.c.bf16 %v2103_v47, %v2101_v52 }
 0x368   :  { %v2022_v7 = vpop.f32.mrf.mxu3 }
 0x369   :  { %2343 = vmatmul.bf16.gmra.mxu2 %v2121_v41  ;;  %v2023_v34 = vadd.f32 %v2022_v7, %v1974_v60 }
 0x36a   :  { %v2073_v22 = vpop.f32.mrf.mxu0 }
 0x36b   :  { %v2072_v5 = vadd.f32 %v2071_v40, %v2023_v34 }
 0x36d   :  { %v2105_v24 = vmax.f32 %v2072_v5, 0.0  ;;  %v2282_v2 = vpop.f32.mrf.mxu1 }
 0x36e   :  { %v2283_v35 = vadd.f32 %v4164_v29, %v2282_v2 }
 0x370   :  { %v2024_v25 = vpop.f32.mrf.mxu3 }
 0x371   :  { %v2025_v0 = vadd.f32 %v2024_v25, %v1976_v38 }
 0x373   :  { %v2074_v59 = vadd.f32 %v2073_v22, %v2025_v0 }
 0x375   :  { %v2107_v39 = vmax.f32 %v2074_v59, 0.0  ;;  %v2285_v21 = vpop.f32.mrf.mxu1 }
 0x376   :  { %v2286_v16 = vadd.f32 %v4164_v29, %v2285_v21 }
 0x377   :  { %v2123_v11 = vpack.c.bf16 %v2107_v39, %v2105_v24 }
 0x379   :  { %2348 = vmatmul.bf16.gmra.mxu2 %v2123_v11 }
 0x37d   :  { %v2287_v10 = vpop.f32.mrf.mxu1 }
 0x37e   :  { %v2288_v8 = vadd.f32 %v4164_v29, %v2287_v10 }
 0x385   :  { %v2290_v20 = vpop.f32.mrf.mxu1 }
 0x386   :  { %v2291_v42 = vadd.f32 %v4164_v29, %v2290_v20 }
 0x38c   :  { %v2314_v45 = vpop.f32.mrf.mxu2 }
 0x38d   :  { %v2315_v53 = vadd.f32 %v2314_v45, %v2266_v50  ;;  %v2292_v54 = vpop.f32.mrf.mxu1 }
 0x38e   :  { %v2293_v41 = vadd.f32 %v4164_v29, %v2292_v54 }
 0x38f   :  { %2354 = vst [vmem:[#allocation7] sm:$0xff] %v2315_v53 }
 0x394   :  { %v2316_v1 = vpop.f32.mrf.mxu2 }
 0x395   :  { %v2317_v15 = vadd.f32 %v2316_v1, %v2268_v61  ;;  %v2295_v47 = vpop.f32.mrf.mxu1 }
 0x396   :  { %v2296_v46 = vadd.f32 %v4164_v29, %v2295_v47 }
 0x397   :  { %2355 = vst [vmem:[#allocation7 + $0x8] sm:$0xff] %v2317_v15 }
 0x39c   :  { %v2319_v12 = vpop.f32.mrf.mxu2 }
 0x39d   :  { %v2320_v13 = vadd.f32 %v2319_v12, %v2271_v30  ;;  %v2297_v44 = vpop.f32.mrf.mxu1 }
 0x39e   :  { %v2298_v33 = vadd.f32 %v4164_v29, %v2297_v44 }
 0x39f   :  { %2356 = vst [vmem:[#allocation7 + $0x10] sm:$0xff] %v2320_v13 }
 0x3a4   :  { %v2321_v43 = vpop.f32.mrf.mxu2 }
 0x3a5   :  { %v2322_v31 = vadd.f32 %v2321_v43, %v2273_v36  ;;  %v2300_v25 = vpop.f32.mrf.mxu1 }
 0x3a6   :  { %v2301_v5 = vadd.f32 %v4164_v29, %v2300_v25 }
 0x3a7   :  { %2357 = vst [vmem:[#allocation7 + $0x18] sm:$0xff] %v2322_v31 }
 0x3ac   :  { %v2324_v56 = vpop.f32.mrf.mxu2 }
 0x3ad   :  { %v2325_v57 = vadd.f32 %v2324_v56, %v2276_v55  ;;  %v2302_v59 = vpop.f32.mrf.mxu1 }
 0x3ae   :  { %v2303_v26 = vadd.f32 %v4164_v29, %v2302_v59 }
 0x3af   :  { %2358 = vst [vmem:[#allocation7 + $0x20] sm:$0xff] %v2325_v57 }
 0x3b4   :  { %v2326_v48 = vpop.f32.mrf.mxu2 }
 0x3b5   :  { %v2327_v4 = vadd.f32 %v2326_v48, %v2278_v9 }
 0x3b7   :  { %2359 = vst [vmem:[#allocation7 + $0x28] sm:$0xff] %v2327_v4 }
 0x3bc   :  { %v2329_v51 = vpop.f32.mrf.mxu2 }
 0x3bd   :  { %v2330_v49 = vadd.f32 %v2329_v51, %v2281_v14 }
 0x3bf   :  { %2360 = vst [vmem:[#allocation7 + $0x30] sm:$0xff] %v2330_v49 }
 0x3c4   :  { %v2331_v18 = vpop.f32.mrf.mxu2 }
 0x3c5   :  { %v2332_v6 = vadd.f32 %v2331_v18, %v2283_v35 }
 0x3c7   :  { %2361 = vst [vmem:[#allocation7 + $0x38] sm:$0xff] %v2332_v6 }
 0x3cc   :  { %v2334_v28 = vpop.f32.mrf.mxu2 }
 0x3cd   :  { %v2335_v19 = vadd.f32 %v2334_v28, %v2286_v16 }
 0x3cf   :  { %2362 = vst [vmem:[#allocation7 + $0x40] sm:$0xff] %v2335_v19 }
 0x3d4   :  { %v2336_v32 = vpop.f32.mrf.mxu2 }
 0x3d5   :  { %v2337_v58 = vadd.f32 %v2336_v32, %v2288_v8 }
 0x3d7   :  { %2363 = vst [vmem:[#allocation7 + $0x48] sm:$0xff] %v2337_v58 }
 0x3dc   :  { %v2339_v17 = vpop.f32.mrf.mxu2 }
 0x3dd   :  { %v2340_v52 = vadd.f32 %v2339_v17, %v2291_v42 }
 0x3df   :  { %2364 = vst [vmem:[#allocation7 + $0x50] sm:$0xff] %v2340_v52 }
 0x3e4   :  { %v2341_v40 = vpop.f32.mrf.mxu2 }
 0x3e5   :  { %v2342_v7 = vadd.f32 %v2341_v40, %v2293_v41 }
 0x3e7   :  { %2365 = vst [vmem:[#allocation7 + $0x58] sm:$0xff] %v2342_v7 }
 0x3ec   :  { %v2344_v60 = vpop.f32.mrf.mxu2 }
 0x3ed   :  { %v2345_v23 = vadd.f32 %v2344_v60, %v2296_v46 }
 0x3ef   :  { %2366 = vst [vmem:[#allocation7 + $0x60] sm:$0xff] %v2345_v23 }
 0x3f4   :  { %v2346_v34 = vpop.f32.mrf.mxu2 }
 0x3f5   :  { %v2347_v38 = vadd.f32 %v2346_v34, %v2298_v33 }
 0x3f7   :  { %2367 = vst [vmem:[#allocation7 + $0x68] sm:$0xff] %v2347_v38 }
 0x3fc   :  { %v2349_v0 = vpop.f32.mrf.mxu2 }
 0x3fd   :  { %v2350_v22 = vadd.f32 %v2349_v0, %v2301_v5 }
 0x3ff   :  { %2368 = vst [vmem:[#allocation7 + $0x70] sm:$0xff] %v2350_v22 }
 0x404   :  { %v2351_v24 = vpop.f32.mrf.mxu2 }
 0x405   :  { %v2352_v39 = vadd.f32 %v2351_v24, %v2303_v26 }
 0x407   :  { %2369 = vst [vmem:[#allocation7 + $0x78] sm:$0xff] %v2352_v39 }
 0x408   :  { %2382 = dma.vmem_to_hbm [thread:$0]  %s2375_s20, 2048, %s2377_s23, [#allocation4], %s3218_s9, %s3218_s9, %s3219_s10  }
 0x409   :  { %3215 = dma.done.wait [#allocation4], 2048  }
 0x40a   :  { %3216 = vsyncadd [#allocation4], 4294965248 }
 0x40b   :  { %2387 = vsyncpa [#allocation3], 1 }
 0x40c   :  { %2388 = vsyncpa [#allocation6], 1 }
 0x40d   :  { %2389 = vsyncpa [#allocation4], 1 }

</bundles_post_ra>
